<compile_context>
chip_gen: v7x
topology: tpu7x:2x2x1
jax: 0.10.0
libtpu: 0.0.40
codegen_flags: <defaults>
</compile_context>

<pallas_src>
import math

import jax
import jax.numpy as jnp
from jax import lax
from jax.experimental import pallas as pl
from jax.experimental.pallas import tpu as pltpu

# ----------------------------- model config ---------------------------------
D_MODEL = 32
D_HEAD = 8
NUM_HEADS = 4
NUM_LAYERS = 2
BATCH = 2
SEQ = 8
D_FF = 4 * D_MODEL
LN_EPS = 1e-5          # torch.nn.LayerNorm default
QKV_PAD = 128          # zero-padded lane-dense width of the fused QKV weight
PPL = 12               # params per layer in the flattened kernel arg list


# --------------------------- in-kernel helpers --------------------------------
def _layernorm(z, g, b):
    # torch.nn.LayerNorm: biased variance, eps inside the sqrt.
    mu = jnp.mean(z, axis=-1, keepdims=True)
    zc = z - mu
    var = jnp.mean(zc * zc, axis=-1, keepdims=True)
    return zc * lax.rsqrt(var + LN_EPS) * g + b


def _gelu(h):
    # exact (erf) GELU, matching torch.nn.GELU() default
    return 0.5 * h * (1.0 + lax.erf(h * (1.0 / math.sqrt(2.0))))


# ------------------------------ fused kernel ----------------------------------
def fused_decoder_kernel(*refs):
    # refs layout:
    #   [0]                         x_ref                  (B*S, D)
    #   [1 : 1+PPL*L]               per-layer params (PPL each, see prepare_params)
    #   [1+PPL*L], [2+PPL*L]        final LN gamma / beta  (1, D)
    #   [3+PPL*L]                   out_ref                (B*S, D)
    L = NUM_LAYERS
    x_ref = refs[0]
    lrefs = refs[1:1 + PPL * L]
    lnf_g_ref = refs[1 + PPL * L]
    lnf_b_ref = refs[2 + PPL * L]
    out_ref = refs[3 + PPL * L]

    B, S, H, Dh, D = BATCH, SEQ, NUM_HEADS, D_HEAD, D_MODEL
    HDh = H * Dh
    scale = 1.0 / math.sqrt(Dh)

    # Causal mask for the stacked (B*H*S, S) score slab, built ONCE and reused
    # by every layer (row index modulo S vs column index).
    row = lax.broadcasted_iota(jnp.int32, (B * H * S, S), 0)
    col = lax.broadcasted_iota(jnp.int32, (B * H * S, S), 1)
    causal = col <= (row % S)

    x2d = x_ref[...]                                    # (B*S, D), stays on-chip

    for layer in range(L):
        (wqkv_ref, bqkv_ref, wo_ref, bo_ref,
         ln1_g_ref, ln1_b_ref,
         w1_ref, b1_ref, w2_ref, b2_ref,
         ln2_g_ref, ln2_b_ref) = lrefs[PPL * layer: PPL * (layer + 1)]

        # ----- causal multi-head self-attention -----
        # TODO(synk): MultiHeadAttention source was not provided; implemented as
        # standard causal decoder attention, scale 1/sqrt(d_head), use_cache=False.

        # Fused QKV projection: ONE (B*S, D) @ (D, 128) matmul for the whole slab.
        qkv = jnp.dot(x2d, wqkv_ref[...],
                      preferred_element_type=jnp.float32) + bqkv_ref[...]

        # Per-(batch, head) q@k^T (no materialized transpose), stacked into a
        # single (B*H*S, S) slab so the softmax runs ONCE for all heads/batches.
        s_list = []
        for b in range(B):
            for h in range(H):
                q_bh = qkv[b * S:(b + 1) * S, h * Dh:(h + 1) * Dh]
                k_bh = qkv[b * S:(b + 1) * S, HDh + h * Dh:HDh + (h + 1) * Dh]
                s_list.append(
                    lax.dot_general(q_bh, k_bh, (((1,), (1,)), ((), ())),
                                    preferred_element_type=jnp.float32))
        scores = jnp.concatenate(s_list, axis=0) * scale          # (B*H*S, S)

        # One batched masked softmax (exact divide for torch parity).
        scores = jnp.where(causal, scores, -1e30)
        m = jnp.max(scores, axis=-1, keepdims=True)
        p = jnp.exp(scores - m)
        denom = jnp.sum(p, axis=-1, keepdims=True)
        p = p / denom

        # Per-(batch, head) P @ V, concatenated back to a (B*S, H*Dh) slab
        # (never leaves registers — no VMEM scratch round-trip).
        o_rows = []
        for b in range(B):
            head_outs = []
            for h in range(H):
                p_bh = p[(b * H + h) * S:(b * H + h + 1) * S, :]
                v_bh = qkv[b * S:(b + 1) * S,
                           2 * HDh + h * Dh:2 * HDh + (h + 1) * Dh]
                head_outs.append(jnp.dot(p_bh, v_bh,
                                         preferred_element_type=jnp.float32))
            o_rows.append(jnp.concatenate(head_outs, axis=-1))    # (S, H*Dh)
        o_cat = jnp.concatenate(o_rows, axis=0)                   # (B*S, H*Dh)

        # Single output projection with the original lane-dense (H*Dh, D) w_o.
        attn_out = jnp.dot(o_cat, wo_ref[...],
                           preferred_element_type=jnp.float32) + bo_ref[...]

        # ----- norm1(x + attn) -----
        x2d = _layernorm(x2d + attn_out, ln1_g_ref[...], ln1_b_ref[...])

        # ----- FFN: Linear -> GELU(erf) -> Linear -----
        h1 = jnp.dot(x2d, w1_ref[...],
                     preferred_element_type=jnp.float32) + b1_ref[...]
        ffn_out = jnp.dot(_gelu(h1), w2_ref[...],
                          preferred_element_type=jnp.float32) + b2_ref[...]

        # ----- norm2(x + ffn) -----
        x2d = _layernorm(x2d + ffn_out, ln2_g_ref[...], ln2_b_ref[...])

    # final LayerNorm
    out_ref[...] = _layernorm(x2d, lnf_g_ref[...], lnf_b_ref[...])


# ------------------------------ parameters ------------------------------------
def init_params(key):
    D, H, Dh, Dff = D_MODEL, NUM_HEADS, D_HEAD, D_FF
    layers = []
    for _ in range(NUM_LAYERS):
        key, kq, kk, kv, ko, k1, k2 = jax.random.split(key, 7)
        layers.append(dict(
            w_q=jax.random.normal(kq, (D, H * Dh), jnp.float32) * 0.05,
            w_k=jax.random.normal(kk, (D, H * Dh), jnp.float32) * 0.05,
            w_v=jax.random.normal(kv, (D, H * Dh), jnp.float32) * 0.05,
            b_q=jnp.zeros((H * Dh,), jnp.float32),
            b_k=jnp.zeros((H * Dh,), jnp.float32),
            b_v=jnp.zeros((H * Dh,), jnp.float32),
            w_o=jax.random.normal(ko, (H * Dh, D), jnp.float32) * 0.05,
            b_o=jnp.zeros((D,), jnp.float32),
            ln1_g=jnp.ones((D,), jnp.float32),
            ln1_b=jnp.zeros((D,), jnp.float32),
            w1=jax.random.normal(k1, (D, Dff), jnp.float32) * 0.05,
            b1=jnp.zeros((Dff,), jnp.float32),
            w2=jax.random.normal(k2, (Dff, D), jnp.float32) * 0.05,
            b2=jnp.zeros((D,), jnp.float32),
            ln2_g=jnp.ones((D,), jnp.float32),
            ln2_b=jnp.zeros((D,), jnp.float32),
        ))
    return dict(layers=layers,
                lnf_g=jnp.ones((D_MODEL,), jnp.float32),
                lnf_b=jnp.zeros((D_MODEL,), jnp.float32))


def prepare_params(params):
    """One-time (outside the forward pass) re-layout: fuse + zero-pad the QKV
    weights/biases into a single lane-dense (D, 128) operand; everything else
    stays in its original lane-dense 2-D layout (head slicing happens on the
    matmul OUTPUTS inside the kernel, never on the weights)."""
    D, H, Dh = D_MODEL, NUM_HEADS, D_HEAD
    HDh = H * Dh
    flat = []
    for lp in params["layers"]:
        w_qkv = jnp.concatenate([lp["w_q"], lp["w_k"], lp["w_v"]], axis=-1)  # (D, 3*HDh)
        b_qkv = jnp.concatenate([lp["b_q"], lp["b_k"], lp["b_v"]], axis=-1)  # (3*HDh,)
        pad = QKV_PAD - 3 * HDh
        if pad > 0:
            w_qkv = jnp.pad(w_qkv, ((0, 0), (0, pad)))
            b_qkv = jnp.pad(b_qkv, ((0, pad),))
        flat += [
            w_qkv,                                 # (D, 128) lane-dense fused QKV
            b_qkv.reshape(1, QKV_PAD),
            lp["w_o"],                             # (H*Dh, D) = (32, 32)
            lp["b_o"].reshape(1, D),
            lp["ln1_g"].reshape(1, D), lp["ln1_b"].reshape(1, D),
            lp["w1"], lp["b1"].reshape(1, D_FF),
            lp["w2"], lp["b2"].reshape(1, D),
            lp["ln2_g"].reshape(1, D), lp["ln2_b"].reshape(1, D),
        ]
    flat += [params["lnf_g"].reshape(1, D), params["lnf_b"].reshape(1, D)]
    return tuple(flat)


# ------------------------------ forward pass -----------------------------------
@jax.jit
def decoder_forward(x, flat_params):
    B, S, D = x.shape
    n_in = 1 + len(flat_params)
    vmem = lambda: pl.BlockSpec(memory_space=pltpu.MemorySpace.VMEM)
    # Single invocation, no grid, no megacore split: at B*S = 16 rows the whole
    # model fits in a few vregs and per-grid-step overhead would dominate.
    out2d = pl.pallas_call(
        fused_decoder_kernel,
        out_shape=jax.ShapeDtypeStruct((B * S, D), jnp.float32),
        in_specs=[vmem() for _ in range(n_in)],
        out_specs=vmem(),
    )(x.reshape(B * S, D), *flat_params)
    return out2d.reshape(B, S, D)


# ------------------------------------ main --------------------------------------
if __name__ == "__main__":
    key = jax.random.PRNGKey(0)
    key, pkey, xkey = jax.random.split(key, 3)
    params = init_params(pkey)
    flat = prepare_params(params)   # one-time weight fuse/pad, outside the fused call

    # Sanity-check the fused kernel's VMEM footprint (well under default budgets).
    footprint = sum(a.size * a.dtype.itemsize for a in flat)
    footprint += 2 * BATCH * SEQ * D_MODEL * 4   # x in, out
    assert footprint < 1 * 1024 * 1024, f"unexpected VMEM footprint: {footprint} B"

    x = jax.random.normal(xkey, (BATCH, SEQ, D_MODEL), jnp.float32)
    out = decoder_forward(x, flat)
    jax.block_until_ready(out)
    assert out.shape == (BATCH, SEQ, D_MODEL)
    assert bool(jnp.all(jnp.isfinite(out)))
    print("KERNEL_OK")
</pallas_src>

<mosaic_0001>
module attributes {stable_mosaic.version = 11 : i64} {
  func.func @fused_decoder_kernel(%arg0: memref<16x32xf32, #tpu.memory_space<vmem>>, %arg1: memref<32x128xf32, #tpu.memory_space<vmem>>, %arg2: memref<1x128xf32, #tpu.memory_space<vmem>>, %arg3: memref<32x32xf32, #tpu.memory_space<vmem>>, %arg4: memref<1x32xf32, #tpu.memory_space<vmem>>, %arg5: memref<1x32xf32, #tpu.memory_space<vmem>>, %arg6: memref<1x32xf32, #tpu.memory_space<vmem>>, %arg7: memref<32x128xf32, #tpu.memory_space<vmem>>, %arg8: memref<1x128xf32, #tpu.memory_space<vmem>>, %arg9: memref<128x32xf32, #tpu.memory_space<vmem>>, %arg10: memref<1x32xf32, #tpu.memory_space<vmem>>, %arg11: memref<1x32xf32, #tpu.memory_space<vmem>>, %arg12: memref<1x32xf32, #tpu.memory_space<vmem>>, %arg13: memref<32x128xf32, #tpu.memory_space<vmem>>, %arg14: memref<1x128xf32, #tpu.memory_space<vmem>>, %arg15: memref<32x32xf32, #tpu.memory_space<vmem>>, %arg16: memref<1x32xf32, #tpu.memory_space<vmem>>, %arg17: memref<1x32xf32, #tpu.memory_space<vmem>>, %arg18: memref<1x32xf32, #tpu.memory_space<vmem>>, %arg19: memref<32x128xf32, #tpu.memory_space<vmem>>, %arg20: memref<1x128xf32, #tpu.memory_space<vmem>>, %arg21: memref<128x32xf32, #tpu.memory_space<vmem>>, %arg22: memref<1x32xf32, #tpu.memory_space<vmem>>, %arg23: memref<1x32xf32, #tpu.memory_space<vmem>>, %arg24: memref<1x32xf32, #tpu.memory_space<vmem>>, %arg25: memref<1x32xf32, #tpu.memory_space<vmem>>, %arg26: memref<1x32xf32, #tpu.memory_space<vmem>>, %arg27: memref<16x32xf32, #tpu.memory_space<vmem>>) attributes {dimension_semantics = [], scalar_prefetch = 0 : i64, scratch_operands = 0 : i64, tpu.core_type = #tpu.core_type<tc>} {
    %0 = tpu.iota {dimensions = array<i32: 0>} : vector<64x8xi32>
    %1 = tpu.iota {dimensions = array<i32: 1>} : vector<64x8xi32>
    %c8_i32 = arith.constant 8 : i32
    %c0_i32 = arith.constant 0 : i32
    %2 = arith.cmpi eq, %c8_i32, %c0_i32 : i32
    %c1_i32 = arith.constant 1 : i32
    %3 = arith.select %2, %c1_i32, %c8_i32 : i32
    %4 = vector.broadcast %3 : i32 to vector<64x8xi32>
    %5 = arith.remsi %0, %4 : vector<64x8xi32>
    %c0_i32_0 = arith.constant 0 : i32
    %6 = vector.broadcast %c0_i32_0 : i32 to vector<64x8xi32>
    %7 = arith.cmpi ne, %5, %6 : vector<64x8xi32>
    %c0_i32_1 = arith.constant 0 : i32
    %8 = vector.broadcast %c0_i32_1 : i32 to vector<64x8xi32>
    %9 = arith.cmpi slt, %5, %8 : vector<64x8xi32>
    %c0_i32_2 = arith.constant 0 : i32
    %10 = arith.cmpi slt, %3, %c0_i32_2 : i32
    %11 = vector.broadcast %10 : i1 to vector<64x8xi1>
    %12 = vector.broadcast %11 : vector<64x8xi1> to vector<64x8xi1>
    %13 = arith.xori %9, %12 : vector<64x8xi1>
    %14 = arith.andi %13, %7 : vector<64x8xi1>
    %15 = vector.broadcast %3 : i32 to vector<64x8xi32>
    %16 = arith.addi %5, %15 : vector<64x8xi32>
    %17 = arith.select %14, %16, %5 : vector<64x8xi1>, vector<64x8xi32>
    %18 = arith.cmpi sle, %1, %17 : vector<64x8xi32>
    %c0 = arith.constant 0 : index
    %c0_3 = arith.constant 0 : index
    %19 = vector.load %arg0[%c0, %c0_3] : memref<16x32xf32, #tpu.memory_space<vmem>>, vector<16x32xf32>
    %c0_4 = arith.constant 0 : index
    %c0_5 = arith.constant 0 : index
    %20 = vector.load %arg1[%c0_4, %c0_5] : memref<32x128xf32, #tpu.memory_space<vmem>>, vector<32x128xf32>
    %cst = arith.constant dense<0.000000e+00> : vector<16x128xf32>
    %21 = tpu.matmul %19, %20, %cst {dimension_numbers = #tpu.dot_dimension_numbers<[1], [0], [0], [1], [0, 0, 1, 1], [], []>} : vector<16x32xf32>, vector<32x128xf32>, vector<16x128xf32> -> vector<16x128xf32>
    %c0_6 = arith.constant 0 : index
    %c0_7 = arith.constant 0 : index
    %22 = vector.load %arg2[%c0_6, %c0_7] : memref<1x128xf32, #tpu.memory_space<vmem>>, vector<1x128xf32>
    %23 = vector.broadcast %22 : vector<1x128xf32> to vector<16x128xf32>
    %24 = arith.addf %21, %23 : vector<16x128xf32>
    %25 = vector.extract_strided_slice %24 {offsets = [0, 0], sizes = [8, 8], strides = [1, 1]} : vector<16x128xf32> to vector<8x8xf32>
    %26 = vector.extract_strided_slice %24 {offsets = [0, 32], sizes = [8, 8], strides = [1, 1]} : vector<16x128xf32> to vector<8x8xf32>
    %cst_8 = arith.constant dense<0.000000e+00> : vector<8x8xf32>
    %27 = tpu.matmul %25, %26, %cst_8 {dimension_numbers = #tpu.dot_dimension_numbers<[1], [1], [0], [0], [0, 0, 1, 0], [], []>} : vector<8x8xf32>, vector<8x8xf32>, vector<8x8xf32> -> vector<8x8xf32>
    %28 = vector.extract_strided_slice %24 {offsets = [0, 8], sizes = [8, 8], strides = [1, 1]} : vector<16x128xf32> to vector<8x8xf32>
    %29 = vector.extract_strided_slice %24 {offsets = [0, 40], sizes = [8, 8], strides = [1, 1]} : vector<16x128xf32> to vector<8x8xf32>
    %cst_9 = arith.constant dense<0.000000e+00> : vector<8x8xf32>
    %30 = tpu.matmul %28, %29, %cst_9 {dimension_numbers = #tpu.dot_dimension_numbers<[1], [1], [0], [0], [0, 0, 1, 0], [], []>} : vector<8x8xf32>, vector<8x8xf32>, vector<8x8xf32> -> vector<8x8xf32>
    %31 = vector.extract_strided_slice %24 {offsets = [0, 16], sizes = [8, 8], strides = [1, 1]} : vector<16x128xf32> to vector<8x8xf32>
    %32 = vector.extract_strided_slice %24 {offsets = [0, 48], sizes = [8, 8], strides = [1, 1]} : vector<16x128xf32> to vector<8x8xf32>
    %cst_10 = arith.constant dense<0.000000e+00> : vector<8x8xf32>
    %33 = tpu.matmul %31, %32, %cst_10 {dimension_numbers = #tpu.dot_dimension_numbers<[1], [1], [0], [0], [0, 0, 1, 0], [], []>} : vector<8x8xf32>, vector<8x8xf32>, vector<8x8xf32> -> vector<8x8xf32>
    %34 = vector.extract_strided_slice %24 {offsets = [0, 24], sizes = [8, 8], strides = [1, 1]} : vector<16x128xf32> to vector<8x8xf32>
    %35 = vector.extract_strided_slice %24 {offsets = [0, 56], sizes = [8, 8], strides = [1, 1]} : vector<16x128xf32> to vector<8x8xf32>
    %cst_11 = arith.constant dense<0.000000e+00> : vector<8x8xf32>
    %36 = tpu.matmul %34, %35, %cst_11 {dimension_numbers = #tpu.dot_dimension_numbers<[1], [1], [0], [0], [0, 0, 1, 0], [], []>} : vector<8x8xf32>, vector<8x8xf32>, vector<8x8xf32> -> vector<8x8xf32>
    %37 = vector.extract_strided_slice %24 {offsets = [8, 0], sizes = [8, 8], strides = [1, 1]} : vector<16x128xf32> to vector<8x8xf32>
    %38 = vector.extract_strided_slice %24 {offsets = [8, 32], sizes = [8, 8], strides = [1, 1]} : vector<16x128xf32> to vector<8x8xf32>
    %cst_12 = arith.constant dense<0.000000e+00> : vector<8x8xf32>
    %39 = tpu.matmul %37, %38, %cst_12 {dimension_numbers = #tpu.dot_dimension_numbers<[1], [1], [0], [0], [0, 0, 1, 0], [], []>} : vector<8x8xf32>, vector<8x8xf32>, vector<8x8xf32> -> vector<8x8xf32>
    %40 = vector.extract_strided_slice %24 {offsets = [8, 8], sizes = [8, 8], strides = [1, 1]} : vector<16x128xf32> to vector<8x8xf32>
    %41 = vector.extract_strided_slice %24 {offsets = [8, 40], sizes = [8, 8], strides = [1, 1]} : vector<16x128xf32> to vector<8x8xf32>
    %cst_13 = arith.constant dense<0.000000e+00> : vector<8x8xf32>
    %42 = tpu.matmul %40, %41, %cst_13 {dimension_numbers = #tpu.dot_dimension_numbers<[1], [1], [0], [0], [0, 0, 1, 0], [], []>} : vector<8x8xf32>, vector<8x8xf32>, vector<8x8xf32> -> vector<8x8xf32>
    %43 = vector.extract_strided_slice %24 {offsets = [8, 16], sizes = [8, 8], strides = [1, 1]} : vector<16x128xf32> to vector<8x8xf32>
    %44 = vector.extract_strided_slice %24 {offsets = [8, 48], sizes = [8, 8], strides = [1, 1]} : vector<16x128xf32> to vector<8x8xf32>
    %cst_14 = arith.constant dense<0.000000e+00> : vector<8x8xf32>
    %45 = tpu.matmul %43, %44, %cst_14 {dimension_numbers = #tpu.dot_dimension_numbers<[1], [1], [0], [0], [0, 0, 1, 0], [], []>} : vector<8x8xf32>, vector<8x8xf32>, vector<8x8xf32> -> vector<8x8xf32>
    %46 = vector.extract_strided_slice %24 {offsets = [8, 24], sizes = [8, 8], strides = [1, 1]} : vector<16x128xf32> to vector<8x8xf32>
    %47 = vector.extract_strided_slice %24 {offsets = [8, 56], sizes = [8, 8], strides = [1, 1]} : vector<16x128xf32> to vector<8x8xf32>
    %cst_15 = arith.constant dense<0.000000e+00> : vector<8x8xf32>
    %48 = tpu.matmul %46, %47, %cst_15 {dimension_numbers = #tpu.dot_dimension_numbers<[1], [1], [0], [0], [0, 0, 1, 0], [], []>} : vector<8x8xf32>, vector<8x8xf32>, vector<8x8xf32> -> vector<8x8xf32>
    %49 = tpu.concatenate %27, %30, %33, %36, %39, %42, %45, %48 in 0 : vector<8x8xf32>, vector<8x8xf32>, vector<8x8xf32>, vector<8x8xf32>, vector<8x8xf32>, vector<8x8xf32>, vector<8x8xf32>, vector<8x8xf32> -> vector<64x8xf32>
    %cst_16 = arith.constant 0.353553385 : f32
    %50 = vector.broadcast %cst_16 : f32 to vector<64x8xf32>
    %51 = arith.mulf %49, %50 : vector<64x8xf32>
    %cst_17 = arith.constant -1.000000e+30 : f32
    %52 = vector.broadcast %cst_17 : f32 to vector<64x8xf32>
    %53 = arith.select %18, %51, %52 : vector<64x8xi1>, vector<64x8xf32>
    %cst_18 = arith.constant dense<0xFF800000> : vector<64xf32>
    %54 = vector.multi_reduction <maximumf>, %53, %cst_18 [1] : vector<64x8xf32> to vector<64xf32>
    %55 = vector.shape_cast %54 : vector<64xf32> to vector<64x1xf32>
    %56 = vector.broadcast %55 : vector<64x1xf32> to vector<64x8xf32>
    %57 = arith.subf %53, %56 : vector<64x8xf32>
    %58 = math.exp %57 : vector<64x8xf32>
    %cst_19 = arith.constant dense<0.000000e+00> : vector<64xf32>
    %59 = vector.multi_reduction <add>, %58, %cst_19 [1] : vector<64x8xf32> to vector<64xf32>
    %60 = vector.shape_cast %59 : vector<64xf32> to vector<64x1xf32>
    %61 = vector.broadcast %60 : vector<64x1xf32> to vector<64x8xf32>
    %62 = arith.divf %58, %61 : vector<64x8xf32>
    %63 = vector.extract_strided_slice %62 {offsets = [0, 0], sizes = [8, 8], strides = [1, 1]} : vector<64x8xf32> to vector<8x8xf32>
    %64 = vector.extract_strided_slice %24 {offsets = [0, 64], sizes = [8, 8], strides = [1, 1]} : vector<16x128xf32> to vector<8x8xf32>
    %cst_20 = arith.constant dense<0.000000e+00> : vector<8x8xf32>
    %65 = tpu.matmul %63, %64, %cst_20 {dimension_numbers = #tpu.dot_dimension_numbers<[1], [0], [0], [1], [0, 0, 1, 1], [], []>} : vector<8x8xf32>, vector<8x8xf32>, vector<8x8xf32> -> vector<8x8xf32>
    %66 = vector.extract_strided_slice %62 {offsets = [8, 0], sizes = [8, 8], strides = [1, 1]} : vector<64x8xf32> to vector<8x8xf32>
    %67 = vector.extract_strided_slice %24 {offsets = [0, 72], sizes = [8, 8], strides = [1, 1]} : vector<16x128xf32> to vector<8x8xf32>
    %cst_21 = arith.constant dense<0.000000e+00> : vector<8x8xf32>
    %68 = tpu.matmul %66, %67, %cst_21 {dimension_numbers = #tpu.dot_dimension_numbers<[1], [0], [0], [1], [0, 0, 1, 1], [], []>} : vector<8x8xf32>, vector<8x8xf32>, vector<8x8xf32> -> vector<8x8xf32>
    %69 = vector.extract_strided_slice %62 {offsets = [16, 0], sizes = [8, 8], strides = [1, 1]} : vector<64x8xf32> to vector<8x8xf32>
    %70 = vector.extract_strided_slice %24 {offsets = [0, 80], sizes = [8, 8], strides = [1, 1]} : vector<16x128xf32> to vector<8x8xf32>
    %cst_22 = arith.constant dense<0.000000e+00> : vector<8x8xf32>
    %71 = tpu.matmul %69, %70, %cst_22 {dimension_numbers = #tpu.dot_dimension_numbers<[1], [0], [0], [1], [0, 0, 1, 1], [], []>} : vector<8x8xf32>, vector<8x8xf32>, vector<8x8xf32> -> vector<8x8xf32>
    %72 = vector.extract_strided_slice %62 {offsets = [24, 0], sizes = [8, 8], strides = [1, 1]} : vector<64x8xf32> to vector<8x8xf32>
    %73 = vector.extract_strided_slice %24 {offsets = [0, 88], sizes = [8, 8], strides = [1, 1]} : vector<16x128xf32> to vector<8x8xf32>
    %cst_23 = arith.constant dense<0.000000e+00> : vector<8x8xf32>
    %74 = tpu.matmul %72, %73, %cst_23 {dimension_numbers = #tpu.dot_dimension_numbers<[1], [0], [0], [1], [0, 0, 1, 1], [], []>} : vector<8x8xf32>, vector<8x8xf32>, vector<8x8xf32> -> vector<8x8xf32>
    %75 = tpu.concatenate %65, %68, %71, %74 in 1 : vector<8x8xf32>, vector<8x8xf32>, vector<8x8xf32>, vector<8x8xf32> -> vector<8x32xf32>
    %76 = vector.extract_strided_slice %62 {offsets = [32, 0], sizes = [8, 8], strides = [1, 1]} : vector<64x8xf32> to vector<8x8xf32>
    %77 = vector.extract_strided_slice %24 {offsets = [8, 64], sizes = [8, 8], strides = [1, 1]} : vector<16x128xf32> to vector<8x8xf32>
    %cst_24 = arith.constant dense<0.000000e+00> : vector<8x8xf32>
    %78 = tpu.matmul %76, %77, %cst_24 {dimension_numbers = #tpu.dot_dimension_numbers<[1], [0], [0], [1], [0, 0, 1, 1], [], []>} : vector<8x8xf32>, vector<8x8xf32>, vector<8x8xf32> -> vector<8x8xf32>
    %79 = vector.extract_strided_slice %62 {offsets = [40, 0], sizes = [8, 8], strides = [1, 1]} : vector<64x8xf32> to vector<8x8xf32>
    %80 = vector.extract_strided_slice %24 {offsets = [8, 72], sizes = [8, 8], strides = [1, 1]} : vector<16x128xf32> to vector<8x8xf32>
    %cst_25 = arith.constant dense<0.000000e+00> : vector<8x8xf32>
    %81 = tpu.matmul %79, %80, %cst_25 {dimension_numbers = #tpu.dot_dimension_numbers<[1], [0], [0], [1], [0, 0, 1, 1], [], []>} : vector<8x8xf32>, vector<8x8xf32>, vector<8x8xf32> -> vector<8x8xf32>
    %82 = vector.extract_strided_slice %62 {offsets = [48, 0], sizes = [8, 8], strides = [1, 1]} : vector<64x8xf32> to vector<8x8xf32>
    %83 = vector.extract_strided_slice %24 {offsets = [8, 80], sizes = [8, 8], strides = [1, 1]} : vector<16x128xf32> to vector<8x8xf32>
    %cst_26 = arith.constant dense<0.000000e+00> : vector<8x8xf32>
    %84 = tpu.matmul %82, %83, %cst_26 {dimension_numbers = #tpu.dot_dimension_numbers<[1], [0], [0], [1], [0, 0, 1, 1], [], []>} : vector<8x8xf32>, vector<8x8xf32>, vector<8x8xf32> -> vector<8x8xf32>
    %85 = vector.extract_strided_slice %62 {offsets = [56, 0], sizes = [8, 8], strides = [1, 1]} : vector<64x8xf32> to vector<8x8xf32>
    %86 = vector.extract_strided_slice %24 {offsets = [8, 88], sizes = [8, 8], strides = [1, 1]} : vector<16x128xf32> to vector<8x8xf32>
    %cst_27 = arith.constant dense<0.000000e+00> : vector<8x8xf32>
    %87 = tpu.matmul %85, %86, %cst_27 {dimension_numbers = #tpu.dot_dimension_numbers<[1], [0], [0], [1], [0, 0, 1, 1], [], []>} : vector<8x8xf32>, vector<8x8xf32>, vector<8x8xf32> -> vector<8x8xf32>
    %88 = tpu.concatenate %78, %81, %84, %87 in 1 : vector<8x8xf32>, vector<8x8xf32>, vector<8x8xf32>, vector<8x8xf32> -> vector<8x32xf32>
    %89 = tpu.concatenate %75, %88 in 0 : vector<8x32xf32>, vector<8x32xf32> -> vector<16x32xf32>
    %c0_28 = arith.constant 0 : index
    %c0_29 = arith.constant 0 : index
    %90 = vector.load %arg3[%c0_28, %c0_29] : memref<32x32xf32, #tpu.memory_space<vmem>>, vector<32x32xf32>
    %cst_30 = arith.constant dense<0.000000e+00> : vector<16x32xf32>
    %91 = tpu.matmul %89, %90, %cst_30 {dimension_numbers = #tpu.dot_dimension_numbers<[1], [0], [0], [1], [0, 0, 1, 1], [], []>} : vector<16x32xf32>, vector<32x32xf32>, vector<16x32xf32> -> vector<16x32xf32>
    %c0_31 = arith.constant 0 : index
    %c0_32 = arith.constant 0 : index
    %92 = vector.load %arg4[%c0_31, %c0_32] : memref<1x32xf32, #tpu.memory_space<vmem>>, vector<1x32xf32>
    %93 = vector.broadcast %92 : vector<1x32xf32> to vector<16x32xf32>
    %94 = arith.addf %91, %93 : vector<16x32xf32>
    %95 = arith.addf %19, %94 : vector<16x32xf32>
    %c0_33 = arith.constant 0 : index
    %c0_34 = arith.constant 0 : index
    %96 = vector.load %arg5[%c0_33, %c0_34] : memref<1x32xf32, #tpu.memory_space<vmem>>, vector<1x32xf32>
    %c0_35 = arith.constant 0 : index
    %c0_36 = arith.constant 0 : index
    %97 = vector.load %arg6[%c0_35, %c0_36] : memref<1x32xf32, #tpu.memory_space<vmem>>, vector<1x32xf32>
    %cst_37 = arith.constant dense<0.000000e+00> : vector<16xf32>
    %98 = vector.multi_reduction <add>, %95, %cst_37 [1] : vector<16x32xf32> to vector<16xf32>
    %99 = vector.shape_cast %98 : vector<16xf32> to vector<16x1xf32>
    %cst_38 = arith.constant 3.200000e+01 : f32
    %100 = vector.broadcast %cst_38 : f32 to vector<16x1xf32>
    %101 = arith.divf %99, %100 : vector<16x1xf32>
    %102 = vector.broadcast %101 : vector<16x1xf32> to vector<16x32xf32>
    %103 = arith.subf %95, %102 : vector<16x32xf32>
    %104 = arith.mulf %103, %103 : vector<16x32xf32>
    %cst_39 = arith.constant dense<0.000000e+00> : vector<16xf32>
    %105 = vector.multi_reduction <add>, %104, %cst_39 [1] : vector<16x32xf32> to vector<16xf32>
    %106 = vector.shape_cast %105 : vector<16xf32> to vector<16x1xf32>
    %cst_40 = arith.constant 3.200000e+01 : f32
    %107 = vector.broadcast %cst_40 : f32 to vector<16x1xf32>
    %108 = arith.divf %106, %107 : vector<16x1xf32>
    %cst_41 = arith.constant 9.99999974E-6 : f32
    %109 = vector.broadcast %cst_41 : f32 to vector<16x1xf32>
    %110 = arith.addf %108, %109 : vector<16x1xf32>
    %111 = math.rsqrt %110 : vector<16x1xf32>
    %112 = vector.broadcast %111 : vector<16x1xf32> to vector<16x32xf32>
    %113 = arith.mulf %103, %112 : vector<16x32xf32>
    %114 = vector.broadcast %96 : vector<1x32xf32> to vector<16x32xf32>
    %115 = arith.mulf %113, %114 : vector<16x32xf32>
    %116 = vector.broadcast %97 : vector<1x32xf32> to vector<16x32xf32>
    %117 = arith.addf %115, %116 : vector<16x32xf32>
    %c0_42 = arith.constant 0 : index
    %c0_43 = arith.constant 0 : index
    %118 = vector.load %arg7[%c0_42, %c0_43] : memref<32x128xf32, #tpu.memory_space<vmem>>, vector<32x128xf32>
    %cst_44 = arith.constant dense<0.000000e+00> : vector<16x128xf32>
    %119 = tpu.matmul %117, %118, %cst_44 {dimension_numbers = #tpu.dot_dimension_numbers<[1], [0], [0], [1], [0, 0, 1, 1], [], []>} : vector<16x32xf32>, vector<32x128xf32>, vector<16x128xf32> -> vector<16x128xf32>
    %c0_45 = arith.constant 0 : index
    %c0_46 = arith.constant 0 : index
    %120 = vector.load %arg8[%c0_45, %c0_46] : memref<1x128xf32, #tpu.memory_space<vmem>>, vector<1x128xf32>
    %121 = vector.broadcast %120 : vector<1x128xf32> to vector<16x128xf32>
    %122 = arith.addf %119, %121 : vector<16x128xf32>
    %cst_47 = arith.constant 5.000000e-01 : f32
    %123 = vector.broadcast %cst_47 : f32 to vector<16x128xf32>
    %124 = arith.mulf %123, %122 : vector<16x128xf32>
    %cst_48 = arith.constant 0.707106769 : f32
    %125 = vector.broadcast %cst_48 : f32 to vector<16x128xf32>
    %126 = arith.mulf %122, %125 : vector<16x128xf32>
    %127 = math.erf %126 : vector<16x128xf32>
    %cst_49 = arith.constant 1.000000e+00 : f32
    %128 = vector.broadcast %cst_49 : f32 to vector<16x128xf32>
    %129 = arith.addf %128, %127 : vector<16x128xf32>
    %130 = arith.mulf %124, %129 : vector<16x128xf32>
    %c0_50 = arith.constant 0 : index
    %c0_51 = arith.constant 0 : index
    %131 = vector.load %arg9[%c0_50, %c0_51] : memref<128x32xf32, #tpu.memory_space<vmem>>, vector<128x32xf32>
    %cst_52 = arith.constant dense<0.000000e+00> : vector<16x32xf32>
    %132 = tpu.matmul %130, %131, %cst_52 {dimension_numbers = #tpu.dot_dimension_numbers<[1], [0], [0], [1], [0, 0, 1, 1], [], []>} : vector<16x128xf32>, vector<128x32xf32>, vector<16x32xf32> -> vector<16x32xf32>
    %c0_53 = arith.constant 0 : index
    %c0_54 = arith.constant 0 : index
    %133 = vector.load %arg10[%c0_53, %c0_54] : memref<1x32xf32, #tpu.memory_space<vmem>>, vector<1x32xf32>
    %134 = vector.broadcast %133 : vector<1x32xf32> to vector<16x32xf32>
    %135 = arith.addf %132, %134 : vector<16x32xf32>
    %136 = arith.addf %117, %135 : vector<16x32xf32>
    %c0_55 = arith.constant 0 : index
    %c0_56 = arith.constant 0 : index
    %137 = vector.load %arg11[%c0_55, %c0_56] : memref<1x32xf32, #tpu.memory_space<vmem>>, vector<1x32xf32>
    %c0_57 = arith.constant 0 : index
    %c0_58 = arith.constant 0 : index
    %138 = vector.load %arg12[%c0_57, %c0_58] : memref<1x32xf32, #tpu.memory_space<vmem>>, vector<1x32xf32>
    %cst_59 = arith.constant dense<0.000000e+00> : vector<16xf32>
    %139 = vector.multi_reduction <add>, %136, %cst_59 [1] : vector<16x32xf32> to vector<16xf32>
    %140 = vector.shape_cast %139 : vector<16xf32> to vector<16x1xf32>
    %cst_60 = arith.constant 3.200000e+01 : f32
    %141 = vector.broadcast %cst_60 : f32 to vector<16x1xf32>
    %142 = arith.divf %140, %141 : vector<16x1xf32>
    %143 = vector.broadcast %142 : vector<16x1xf32> to vector<16x32xf32>
    %144 = arith.subf %136, %143 : vector<16x32xf32>
    %145 = arith.mulf %144, %144 : vector<16x32xf32>
    %cst_61 = arith.constant dense<0.000000e+00> : vector<16xf32>
    %146 = vector.multi_reduction <add>, %145, %cst_61 [1] : vector<16x32xf32> to vector<16xf32>
    %147 = vector.shape_cast %146 : vector<16xf32> to vector<16x1xf32>
    %cst_62 = arith.constant 3.200000e+01 : f32
    %148 = vector.broadcast %cst_62 : f32 to vector<16x1xf32>
    %149 = arith.divf %147, %148 : vector<16x1xf32>
    %cst_63 = arith.constant 9.99999974E-6 : f32
    %150 = vector.broadcast %cst_63 : f32 to vector<16x1xf32>
    %151 = arith.addf %149, %150 : vector<16x1xf32>
    %152 = math.rsqrt %151 : vector<16x1xf32>
    %153 = vector.broadcast %152 : vector<16x1xf32> to vector<16x32xf32>
    %154 = arith.mulf %144, %153 : vector<16x32xf32>
    %155 = vector.broadcast %137 : vector<1x32xf32> to vector<16x32xf32>
    %156 = arith.mulf %154, %155 : vector<16x32xf32>
    %157 = vector.broadcast %138 : vector<1x32xf32> to vector<16x32xf32>
    %158 = arith.addf %156, %157 : vector<16x32xf32>
    %c0_64 = arith.constant 0 : index
    %c0_65 = arith.constant 0 : index
    %159 = vector.load %arg13[%c0_64, %c0_65] : memref<32x128xf32, #tpu.memory_space<vmem>>, vector<32x128xf32>
    %cst_66 = arith.constant dense<0.000000e+00> : vector<16x128xf32>
    %160 = tpu.matmul %158, %159, %cst_66 {dimension_numbers = #tpu.dot_dimension_numbers<[1], [0], [0], [1], [0, 0, 1, 1], [], []>} : vector<16x32xf32>, vector<32x128xf32>, vector<16x128xf32> -> vector<16x128xf32>
    %c0_67 = arith.constant 0 : index
    %c0_68 = arith.constant 0 : index
    %161 = vector.load %arg14[%c0_67, %c0_68] : memref<1x128xf32, #tpu.memory_space<vmem>>, vector<1x128xf32>
    %162 = vector.broadcast %161 : vector<1x128xf32> to vector<16x128xf32>
    %163 = arith.addf %160, %162 : vector<16x128xf32>
    %164 = vector.extract_strided_slice %163 {offsets = [0, 0], sizes = [8, 8], strides = [1, 1]} : vector<16x128xf32> to vector<8x8xf32>
    %165 = vector.extract_strided_slice %163 {offsets = [0, 32], sizes = [8, 8], strides = [1, 1]} : vector<16x128xf32> to vector<8x8xf32>
    %cst_69 = arith.constant dense<0.000000e+00> : vector<8x8xf32>
    %166 = tpu.matmul %164, %165, %cst_69 {dimension_numbers = #tpu.dot_dimension_numbers<[1], [1], [0], [0], [0, 0, 1, 0], [], []>} : vector<8x8xf32>, vector<8x8xf32>, vector<8x8xf32> -> vector<8x8xf32>
    %167 = vector.extract_strided_slice %163 {offsets = [0, 8], sizes = [8, 8], strides = [1, 1]} : vector<16x128xf32> to vector<8x8xf32>
    %168 = vector.extract_strided_slice %163 {offsets = [0, 40], sizes = [8, 8], strides = [1, 1]} : vector<16x128xf32> to vector<8x8xf32>
    %cst_70 = arith.constant dense<0.000000e+00> : vector<8x8xf32>
    %169 = tpu.matmul %167, %168, %cst_70 {dimension_numbers = #tpu.dot_dimension_numbers<[1], [1], [0], [0], [0, 0, 1, 0], [], []>} : vector<8x8xf32>, vector<8x8xf32>, vector<8x8xf32> -> vector<8x8xf32>
    %170 = vector.extract_strided_slice %163 {offsets = [0, 16], sizes = [8, 8], strides = [1, 1]} : vector<16x128xf32> to vector<8x8xf32>
    %171 = vector.extract_strided_slice %163 {offsets = [0, 48], sizes = [8, 8], strides = [1, 1]} : vector<16x128xf32> to vector<8x8xf32>
    %cst_71 = arith.constant dense<0.000000e+00> : vector<8x8xf32>
    %172 = tpu.matmul %170, %171, %cst_71 {dimension_numbers = #tpu.dot_dimension_numbers<[1], [1], [0], [0], [0, 0, 1, 0], [], []>} : vector<8x8xf32>, vector<8x8xf32>, vector<8x8xf32> -> vector<8x8xf32>
    %173 = vector.extract_strided_slice %163 {offsets = [0, 24], sizes = [8, 8], strides = [1, 1]} : vector<16x128xf32> to vector<8x8xf32>
    %174 = vector.extract_strided_slice %163 {offsets = [0, 56], sizes = [8, 8], strides = [1, 1]} : vector<16x128xf32> to vector<8x8xf32>
    %cst_72 = arith.constant dense<0.000000e+00> : vector<8x8xf32>
    %175 = tpu.matmul %173, %174, %cst_72 {dimension_numbers = #tpu.dot_dimension_numbers<[1], [1], [0], [0], [0, 0, 1, 0], [], []>} : vector<8x8xf32>, vector<8x8xf32>, vector<8x8xf32> -> vector<8x8xf32>
    %176 = vector.extract_strided_slice %163 {offsets = [8, 0], sizes = [8, 8], strides = [1, 1]} : vector<16x128xf32> to vector<8x8xf32>
    %177 = vector.extract_strided_slice %163 {offsets = [8, 32], sizes = [8, 8], strides = [1, 1]} : vector<16x128xf32> to vector<8x8xf32>
    %cst_73 = arith.constant dense<0.000000e+00> : vector<8x8xf32>
    %178 = tpu.matmul %176, %177, %cst_73 {dimension_numbers = #tpu.dot_dimension_numbers<[1], [1], [0], [0], [0, 0, 1, 0], [], []>} : vector<8x8xf32>, vector<8x8xf32>, vector<8x8xf32> -> vector<8x8xf32>
    %179 = vector.extract_strided_slice %163 {offsets = [8, 8], sizes = [8, 8], strides = [1, 1]} : vector<16x128xf32> to vector<8x8xf32>
    %180 = vector.extract_strided_slice %163 {offsets = [8, 40], sizes = [8, 8], strides = [1, 1]} : vector<16x128xf32> to vector<8x8xf32>
    %cst_74 = arith.constant dense<0.000000e+00> : vector<8x8xf32>
    %181 = tpu.matmul %179, %180, %cst_74 {dimension_numbers = #tpu.dot_dimension_numbers<[1], [1], [0], [0], [0, 0, 1, 0], [], []>} : vector<8x8xf32>, vector<8x8xf32>, vector<8x8xf32> -> vector<8x8xf32>
    %182 = vector.extract_strided_slice %163 {offsets = [8, 16], sizes = [8, 8], strides = [1, 1]} : vector<16x128xf32> to vector<8x8xf32>
    %183 = vector.extract_strided_slice %163 {offsets = [8, 48], sizes = [8, 8], strides = [1, 1]} : vector<16x128xf32> to vector<8x8xf32>
    %cst_75 = arith.constant dense<0.000000e+00> : vector<8x8xf32>
    %184 = tpu.matmul %182, %183, %cst_75 {dimension_numbers = #tpu.dot_dimension_numbers<[1], [1], [0], [0], [0, 0, 1, 0], [], []>} : vector<8x8xf32>, vector<8x8xf32>, vector<8x8xf32> -> vector<8x8xf32>
    %185 = vector.extract_strided_slice %163 {offsets = [8, 24], sizes = [8, 8], strides = [1, 1]} : vector<16x128xf32> to vector<8x8xf32>
    %186 = vector.extract_strided_slice %163 {offsets = [8, 56], sizes = [8, 8], strides = [1, 1]} : vector<16x128xf32> to vector<8x8xf32>
    %cst_76 = arith.constant dense<0.000000e+00> : vector<8x8xf32>
    %187 = tpu.matmul %185, %186, %cst_76 {dimension_numbers = #tpu.dot_dimension_numbers<[1], [1], [0], [0], [0, 0, 1, 0], [], []>} : vector<8x8xf32>, vector<8x8xf32>, vector<8x8xf32> -> vector<8x8xf32>
    %188 = tpu.concatenate %166, %169, %172, %175, %178, %181, %184, %187 in 0 : vector<8x8xf32>, vector<8x8xf32>, vector<8x8xf32>, vector<8x8xf32>, vector<8x8xf32>, vector<8x8xf32>, vector<8x8xf32>, vector<8x8xf32> -> vector<64x8xf32>
    %cst_77 = arith.constant 0.353553385 : f32
    %189 = vector.broadcast %cst_77 : f32 to vector<64x8xf32>
    %190 = arith.mulf %188, %189 : vector<64x8xf32>
    %cst_78 = arith.constant -1.000000e+30 : f32
    %191 = vector.broadcast %cst_78 : f32 to vector<64x8xf32>
    %192 = arith.select %18, %190, %191 : vector<64x8xi1>, vector<64x8xf32>
    %cst_79 = arith.constant dense<0xFF800000> : vector<64xf32>
    %193 = vector.multi_reduction <maximumf>, %192, %cst_79 [1] : vector<64x8xf32> to vector<64xf32>
    %194 = vector.shape_cast %193 : vector<64xf32> to vector<64x1xf32>
    %195 = vector.broadcast %194 : vector<64x1xf32> to vector<64x8xf32>
    %196 = arith.subf %192, %195 : vector<64x8xf32>
    %197 = math.exp %196 : vector<64x8xf32>
    %cst_80 = arith.constant dense<0.000000e+00> : vector<64xf32>
    %198 = vector.multi_reduction <add>, %197, %cst_80 [1] : vector<64x8xf32> to vector<64xf32>
    %199 = vector.shape_cast %198 : vector<64xf32> to vector<64x1xf32>
    %200 = vector.broadcast %199 : vector<64x1xf32> to vector<64x8xf32>
    %201 = arith.divf %197, %200 : vector<64x8xf32>
    %202 = vector.extract_strided_slice %201 {offsets = [0, 0], sizes = [8, 8], strides = [1, 1]} : vector<64x8xf32> to vector<8x8xf32>
    %203 = vector.extract_strided_slice %163 {offsets = [0, 64], sizes = [8, 8], strides = [1, 1]} : vector<16x128xf32> to vector<8x8xf32>
    %cst_81 = arith.constant dense<0.000000e+00> : vector<8x8xf32>
    %204 = tpu.matmul %202, %203, %cst_81 {dimension_numbers = #tpu.dot_dimension_numbers<[1], [0], [0], [1], [0, 0, 1, 1], [], []>} : vector<8x8xf32>, vector<8x8xf32>, vector<8x8xf32> -> vector<8x8xf32>
    %205 = vector.extract_strided_slice %201 {offsets = [8, 0], sizes = [8, 8], strides = [1, 1]} : vector<64x8xf32> to vector<8x8xf32>
    %206 = vector.extract_strided_slice %163 {offsets = [0, 72], sizes = [8, 8], strides = [1, 1]} : vector<16x128xf32> to vector<8x8xf32>
    %cst_82 = arith.constant dense<0.000000e+00> : vector<8x8xf32>
    %207 = tpu.matmul %205, %206, %cst_82 {dimension_numbers = #tpu.dot_dimension_numbers<[1], [0], [0], [1], [0, 0, 1, 1], [], []>} : vector<8x8xf32>, vector<8x8xf32>, vector<8x8xf32> -> vector<8x8xf32>
    %208 = vector.extract_strided_slice %201 {offsets = [16, 0], sizes = [8, 8], strides = [1, 1]} : vector<64x8xf32> to vector<8x8xf32>
    %209 = vector.extract_strided_slice %163 {offsets = [0, 80], sizes = [8, 8], strides = [1, 1]} : vector<16x128xf32> to vector<8x8xf32>
    %cst_83 = arith.constant dense<0.000000e+00> : vector<8x8xf32>
    %210 = tpu.matmul %208, %209, %cst_83 {dimension_numbers = #tpu.dot_dimension_numbers<[1], [0], [0], [1], [0, 0, 1, 1], [], []>} : vector<8x8xf32>, vector<8x8xf32>, vector<8x8xf32> -> vector<8x8xf32>
    %211 = vector.extract_strided_slice %201 {offsets = [24, 0], sizes = [8, 8], strides = [1, 1]} : vector<64x8xf32> to vector<8x8xf32>
    %212 = vector.extract_strided_slice %163 {offsets = [0, 88], sizes = [8, 8], strides = [1, 1]} : vector<16x128xf32> to vector<8x8xf32>
    %cst_84 = arith.constant dense<0.000000e+00> : vector<8x8xf32>
    %213 = tpu.matmul %211, %212, %cst_84 {dimension_numbers = #tpu.dot_dimension_numbers<[1], [0], [0], [1], [0, 0, 1, 1], [], []>} : vector<8x8xf32>, vector<8x8xf32>, vector<8x8xf32> -> vector<8x8xf32>
    %214 = tpu.concatenate %204, %207, %210, %213 in 1 : vector<8x8xf32>, vector<8x8xf32>, vector<8x8xf32>, vector<8x8xf32> -> vector<8x32xf32>
    %215 = vector.extract_strided_slice %201 {offsets = [32, 0], sizes = [8, 8], strides = [1, 1]} : vector<64x8xf32> to vector<8x8xf32>
    %216 = vector.extract_strided_slice %163 {offsets = [8, 64], sizes = [8, 8], strides = [1, 1]} : vector<16x128xf32> to vector<8x8xf32>
    %cst_85 = arith.constant dense<0.000000e+00> : vector<8x8xf32>
    %217 = tpu.matmul %215, %216, %cst_85 {dimension_numbers = #tpu.dot_dimension_numbers<[1], [0], [0], [1], [0, 0, 1, 1], [], []>} : vector<8x8xf32>, vector<8x8xf32>, vector<8x8xf32> -> vector<8x8xf32>
    %218 = vector.extract_strided_slice %201 {offsets = [40, 0], sizes = [8, 8], strides = [1, 1]} : vector<64x8xf32> to vector<8x8xf32>
    %219 = vector.extract_strided_slice %163 {offsets = [8, 72], sizes = [8, 8], strides = [1, 1]} : vector<16x128xf32> to vector<8x8xf32>
    %cst_86 = arith.constant dense<0.000000e+00> : vector<8x8xf32>
    %220 = tpu.matmul %218, %219, %cst_86 {dimension_numbers = #tpu.dot_dimension_numbers<[1], [0], [0], [1], [0, 0, 1, 1], [], []>} : vector<8x8xf32>, vector<8x8xf32>, vector<8x8xf32> -> vector<8x8xf32>
    %221 = vector.extract_strided_slice %201 {offsets = [48, 0], sizes = [8, 8], strides = [1, 1]} : vector<64x8xf32> to vector<8x8xf32>
    %222 = vector.extract_strided_slice %163 {offsets = [8, 80], sizes = [8, 8], strides = [1, 1]} : vector<16x128xf32> to vector<8x8xf32>
    %cst_87 = arith.constant dense<0.000000e+00> : vector<8x8xf32>
    %223 = tpu.matmul %221, %222, %cst_87 {dimension_numbers = #tpu.dot_dimension_numbers<[1], [0], [0], [1], [0, 0, 1, 1], [], []>} : vector<8x8xf32>, vector<8x8xf32>, vector<8x8xf32> -> vector<8x8xf32>
    %224 = vector.extract_strided_slice %201 {offsets = [56, 0], sizes = [8, 8], strides = [1, 1]} : vector<64x8xf32> to vector<8x8xf32>
    %225 = vector.extract_strided_slice %163 {offsets = [8, 88], sizes = [8, 8], strides = [1, 1]} : vector<16x128xf32> to vector<8x8xf32>
    %cst_88 = arith.constant dense<0.000000e+00> : vector<8x8xf32>
    %226 = tpu.matmul %224, %225, %cst_88 {dimension_numbers = #tpu.dot_dimension_numbers<[1], [0], [0], [1], [0, 0, 1, 1], [], []>} : vector<8x8xf32>, vector<8x8xf32>, vector<8x8xf32> -> vector<8x8xf32>
    %227 = tpu.concatenate %217, %220, %223, %226 in 1 : vector<8x8xf32>, vector<8x8xf32>, vector<8x8xf32>, vector<8x8xf32> -> vector<8x32xf32>
    %228 = tpu.concatenate %214, %227 in 0 : vector<8x32xf32>, vector<8x32xf32> -> vector<16x32xf32>
    %c0_89 = arith.constant 0 : index
    %c0_90 = arith.constant 0 : index
    %229 = vector.load %arg15[%c0_89, %c0_90] : memref<32x32xf32, #tpu.memory_space<vmem>>, vector<32x32xf32>
    %cst_91 = arith.constant dense<0.000000e+00> : vector<16x32xf32>
    %230 = tpu.matmul %228, %229, %cst_91 {dimension_numbers = #tpu.dot_dimension_numbers<[1], [0], [0], [1], [0, 0, 1, 1], [], []>} : vector<16x32xf32>, vector<32x32xf32>, vector<16x32xf32> -> vector<16x32xf32>
    %c0_92 = arith.constant 0 : index
    %c0_93 = arith.constant 0 : index
    %231 = vector.load %arg16[%c0_92, %c0_93] : memref<1x32xf32, #tpu.memory_space<vmem>>, vector<1x32xf32>
    %232 = vector.broadcast %231 : vector<1x32xf32> to vector<16x32xf32>
    %233 = arith.addf %230, %232 : vector<16x32xf32>
    %234 = arith.addf %158, %233 : vector<16x32xf32>
    %c0_94 = arith.constant 0 : index
    %c0_95 = arith.constant 0 : index
    %235 = vector.load %arg17[%c0_94, %c0_95] : memref<1x32xf32, #tpu.memory_space<vmem>>, vector<1x32xf32>
    %c0_96 = arith.constant 0 : index
    %c0_97 = arith.constant 0 : index
    %236 = vector.load %arg18[%c0_96, %c0_97] : memref<1x32xf32, #tpu.memory_space<vmem>>, vector<1x32xf32>
    %cst_98 = arith.constant dense<0.000000e+00> : vector<16xf32>
    %237 = vector.multi_reduction <add>, %234, %cst_98 [1] : vector<16x32xf32> to vector<16xf32>
    %238 = vector.shape_cast %237 : vector<16xf32> to vector<16x1xf32>
    %cst_99 = arith.constant 3.200000e+01 : f32
    %239 = vector.broadcast %cst_99 : f32 to vector<16x1xf32>
    %240 = arith.divf %238, %239 : vector<16x1xf32>
    %241 = vector.broadcast %240 : vector<16x1xf32> to vector<16x32xf32>
    %242 = arith.subf %234, %241 : vector<16x32xf32>
    %243 = arith.mulf %242, %242 : vector<16x32xf32>
    %cst_100 = arith.constant dense<0.000000e+00> : vector<16xf32>
    %244 = vector.multi_reduction <add>, %243, %cst_100 [1] : vector<16x32xf32> to vector<16xf32>
    %245 = vector.shape_cast %244 : vector<16xf32> to vector<16x1xf32>
    %cst_101 = arith.constant 3.200000e+01 : f32
    %246 = vector.broadcast %cst_101 : f32 to vector<16x1xf32>
    %247 = arith.divf %245, %246 : vector<16x1xf32>
    %cst_102 = arith.constant 9.99999974E-6 : f32
    %248 = vector.broadcast %cst_102 : f32 to vector<16x1xf32>
    %249 = arith.addf %247, %248 : vector<16x1xf32>
    %250 = math.rsqrt %249 : vector<16x1xf32>
    %251 = vector.broadcast %250 : vector<16x1xf32> to vector<16x32xf32>
    %252 = arith.mulf %242, %251 : vector<16x32xf32>
    %253 = vector.broadcast %235 : vector<1x32xf32> to vector<16x32xf32>
    %254 = arith.mulf %252, %253 : vector<16x32xf32>
    %255 = vector.broadcast %236 : vector<1x32xf32> to vector<16x32xf32>
    %256 = arith.addf %254, %255 : vector<16x32xf32>
    %c0_103 = arith.constant 0 : index
    %c0_104 = arith.constant 0 : index
    %257 = vector.load %arg19[%c0_103, %c0_104] : memref<32x128xf32, #tpu.memory_space<vmem>>, vector<32x128xf32>
    %cst_105 = arith.constant dense<0.000000e+00> : vector<16x128xf32>
    %258 = tpu.matmul %256, %257, %cst_105 {dimension_numbers = #tpu.dot_dimension_numbers<[1], [0], [0], [1], [0, 0, 1, 1], [], []>} : vector<16x32xf32>, vector<32x128xf32>, vector<16x128xf32> -> vector<16x128xf32>
    %c0_106 = arith.constant 0 : index
    %c0_107 = arith.constant 0 : index
    %259 = vector.load %arg20[%c0_106, %c0_107] : memref<1x128xf32, #tpu.memory_space<vmem>>, vector<1x128xf32>
    %260 = vector.broadcast %259 : vector<1x128xf32> to vector<16x128xf32>
    %261 = arith.addf %258, %260 : vector<16x128xf32>
    %cst_108 = arith.constant 5.000000e-01 : f32
    %262 = vector.broadcast %cst_108 : f32 to vector<16x128xf32>
    %263 = arith.mulf %262, %261 : vector<16x128xf32>
    %cst_109 = arith.constant 0.707106769 : f32
    %264 = vector.broadcast %cst_109 : f32 to vector<16x128xf32>
    %265 = arith.mulf %261, %264 : vector<16x128xf32>
    %266 = math.erf %265 : vector<16x128xf32>
    %cst_110 = arith.constant 1.000000e+00 : f32
    %267 = vector.broadcast %cst_110 : f32 to vector<16x128xf32>
    %268 = arith.addf %267, %266 : vector<16x128xf32>
    %269 = arith.mulf %263, %268 : vector<16x128xf32>
    %c0_111 = arith.constant 0 : index
    %c0_112 = arith.constant 0 : index
    %270 = vector.load %arg21[%c0_111, %c0_112] : memref<128x32xf32, #tpu.memory_space<vmem>>, vector<128x32xf32>
    %cst_113 = arith.constant dense<0.000000e+00> : vector<16x32xf32>
    %271 = tpu.matmul %269, %270, %cst_113 {dimension_numbers = #tpu.dot_dimension_numbers<[1], [0], [0], [1], [0, 0, 1, 1], [], []>} : vector<16x128xf32>, vector<128x32xf32>, vector<16x32xf32> -> vector<16x32xf32>
    %c0_114 = arith.constant 0 : index
    %c0_115 = arith.constant 0 : index
    %272 = vector.load %arg22[%c0_114, %c0_115] : memref<1x32xf32, #tpu.memory_space<vmem>>, vector<1x32xf32>
    %273 = vector.broadcast %272 : vector<1x32xf32> to vector<16x32xf32>
    %274 = arith.addf %271, %273 : vector<16x32xf32>
    %275 = arith.addf %256, %274 : vector<16x32xf32>
    %c0_116 = arith.constant 0 : index
    %c0_117 = arith.constant 0 : index
    %276 = vector.load %arg23[%c0_116, %c0_117] : memref<1x32xf32, #tpu.memory_space<vmem>>, vector<1x32xf32>
    %c0_118 = arith.constant 0 : index
    %c0_119 = arith.constant 0 : index
    %277 = vector.load %arg24[%c0_118, %c0_119] : memref<1x32xf32, #tpu.memory_space<vmem>>, vector<1x32xf32>
    %cst_120 = arith.constant dense<0.000000e+00> : vector<16xf32>
    %278 = vector.multi_reduction <add>, %275, %cst_120 [1] : vector<16x32xf32> to vector<16xf32>
    %279 = vector.shape_cast %278 : vector<16xf32> to vector<16x1xf32>
    %cst_121 = arith.constant 3.200000e+01 : f32
    %280 = vector.broadcast %cst_121 : f32 to vector<16x1xf32>
    %281 = arith.divf %279, %280 : vector<16x1xf32>
    %282 = vector.broadcast %281 : vector<16x1xf32> to vector<16x32xf32>
    %283 = arith.subf %275, %282 : vector<16x32xf32>
    %284 = arith.mulf %283, %283 : vector<16x32xf32>
    %cst_122 = arith.constant dense<0.000000e+00> : vector<16xf32>
    %285 = vector.multi_reduction <add>, %284, %cst_122 [1] : vector<16x32xf32> to vector<16xf32>
    %286 = vector.shape_cast %285 : vector<16xf32> to vector<16x1xf32>
    %cst_123 = arith.constant 3.200000e+01 : f32
    %287 = vector.broadcast %cst_123 : f32 to vector<16x1xf32>
    %288 = arith.divf %286, %287 : vector<16x1xf32>
    %cst_124 = arith.constant 9.99999974E-6 : f32
    %289 = vector.broadcast %cst_124 : f32 to vector<16x1xf32>
    %290 = arith.addf %288, %289 : vector<16x1xf32>
    %291 = math.rsqrt %290 : vector<16x1xf32>
    %292 = vector.broadcast %291 : vector<16x1xf32> to vector<16x32xf32>
    %293 = arith.mulf %283, %292 : vector<16x32xf32>
    %294 = vector.broadcast %276 : vector<1x32xf32> to vector<16x32xf32>
    %295 = arith.mulf %293, %294 : vector<16x32xf32>
    %296 = vector.broadcast %277 : vector<1x32xf32> to vector<16x32xf32>
    %297 = arith.addf %295, %296 : vector<16x32xf32>
    %c0_125 = arith.constant 0 : index
    %c0_126 = arith.constant 0 : index
    %298 = vector.load %arg25[%c0_125, %c0_126] : memref<1x32xf32, #tpu.memory_space<vmem>>, vector<1x32xf32>
    %c0_127 = arith.constant 0 : index
    %c0_128 = arith.constant 0 : index
    %299 = vector.load %arg26[%c0_127, %c0_128] : memref<1x32xf32, #tpu.memory_space<vmem>>, vector<1x32xf32>
    %cst_129 = arith.constant dense<0.000000e+00> : vector<16xf32>
    %300 = vector.multi_reduction <add>, %297, %cst_129 [1] : vector<16x32xf32> to vector<16xf32>
    %301 = vector.shape_cast %300 : vector<16xf32> to vector<16x1xf32>
    %cst_130 = arith.constant 3.200000e+01 : f32
    %302 = vector.broadcast %cst_130 : f32 to vector<16x1xf32>
    %303 = arith.divf %301, %302 : vector<16x1xf32>
    %304 = vector.broadcast %303 : vector<16x1xf32> to vector<16x32xf32>
    %305 = arith.subf %297, %304 : vector<16x32xf32>
    %306 = arith.mulf %305, %305 : vector<16x32xf32>
    %cst_131 = arith.constant dense<0.000000e+00> : vector<16xf32>
    %307 = vector.multi_reduction <add>, %306, %cst_131 [1] : vector<16x32xf32> to vector<16xf32>
    %308 = vector.shape_cast %307 : vector<16xf32> to vector<16x1xf32>
    %cst_132 = arith.constant 3.200000e+01 : f32
    %309 = vector.broadcast %cst_132 : f32 to vector<16x1xf32>
    %310 = arith.divf %308, %309 : vector<16x1xf32>
    %cst_133 = arith.constant 9.99999974E-6 : f32
    %311 = vector.broadcast %cst_133 : f32 to vector<16x1xf32>
    %312 = arith.addf %310, %311 : vector<16x1xf32>
    %313 = math.rsqrt %312 : vector<16x1xf32>
    %314 = vector.broadcast %313 : vector<16x1xf32> to vector<16x32xf32>
    %315 = arith.mulf %305, %314 : vector<16x32xf32>
    %316 = vector.broadcast %298 : vector<1x32xf32> to vector<16x32xf32>
    %317 = arith.mulf %315, %316 : vector<16x32xf32>
    %318 = vector.broadcast %299 : vector<1x32xf32> to vector<16x32xf32>
    %319 = arith.addf %317, %318 : vector<16x32xf32>
    %c0_134 = arith.constant 0 : index
    %c0_135 = arith.constant 0 : index
    %320 = vector.load %arg27[%c0_134, %c0_135] : memref<16x32xf32, #tpu.memory_space<vmem>>, vector<16x32xf32>
    tpu.vector_store %arg27[%c0_134, %c0_135], %319 {strides = array<i32>} : memref<16x32xf32, #tpu.memory_space<vmem>>, vector<16x32xf32>,
    return
  }
}

</mosaic_0001>

<bundles_post_ra>
// kernel: decoder_forward.1
= control target key start
LH: loop header
LB: loop body
LE: loop exit
PB: predicated region body
PF: predicated region fallthrough
CT: control target
= control target key end

     0   :  { %s5556_s0 = inlined_call_operand.vmem [shape: f32[16,32], index: 0, kind: input, shape index: {}]   ;;  %s5557_s1 = inlined_call_operand.vmem [shape: f32[32,128], index: 1, kind: input, shape index: {}]   ;;  %s5558_s2 = inlined_call_operand.vmem [shape: f32[1,128], index: 2, kind: input, shape index: {}]   ;;  %s5559_s3 = inlined_call_operand.vmem [shape: f32[32,32], index: 3, kind: input, shape index: {}]   ;;  %s5560_s4 = inlined_call_operand.vmem [shape: f32[1,32], index: 4, kind: input, shape index: {}]   ;;  %s5561_s5 = inlined_call_operand.vmem [shape: f32[1,32], index: 5, kind: input, shape index: {}]   ;;  %s5562_s6 = inlined_call_operand.vmem [shape: f32[1,32], index: 6, kind: input, shape index: {}]   ;;  %s5563_s7 = inlined_call_operand.vmem [shape: f32[32,128], index: 7, kind: input, shape index: {}]   ;;  %s5564_s8 = inlined_call_operand.vmem [shape: f32[1,128], index: 8, kind: input, shape index: {}]   ;;  %s5565_s9 = inlined_call_operand.vmem [shape: f32[128,32], index: 9, kind: input, shape index: {}]   ;;  %s5566_s10 = inlined_call_operand.vmem [shape: f32[1,32], index: 10, kind: input, shape index: {}]   ;;  %s5567_s11 = inlined_call_operand.vmem [shape: f32[1,32], index: 11, kind: input, shape index: {}]   ;;  %s5568_s12 = inlined_call_operand.vmem [shape: f32[1,32], index: 12, kind: input, shape index: {}]   ;;  %s5569_s13 = inlined_call_operand.vmem [shape: f32[32,128], index: 13, kind: input, shape index: {}]   ;;  %s5570_s14 = inlined_call_operand.vmem [shape: f32[1,128], index: 14, kind: input, shape index: {}]   ;;  %s5571_s15 = inlined_call_operand.vmem [shape: f32[32,32], index: 15, kind: input, shape index: {}]   ;;  %s5572_s16 = inlined_call_operand.vmem [shape: f32[1,32], index: 16, kind: input, shape index: {}]   ;;  %s5573_s17 = inlined_call_operand.vmem [shape: f32[1,32], index: 17, kind: input, shape index: {}]   ;;  %s5574_s18 = inlined_call_operand.vmem [shape: f32[1,32], index: 18, kind: input, shape index: {}]   ;;  %s5575_s19 = inlined_call_operand.vmem [shape: f32[32,128], index: 19, kind: input, shape index: {}]   ;;  %s5576_s20 = inlined_call_operand.vmem [shape: f32[1,128], index: 20, kind: input, shape index: {}]   ;;  %s5577_s21 = inlined_call_operand.vmem [shape: f32[128,32], index: 21, kind: input, shape index: {}]   ;;  %s5578_s22 = inlined_call_operand.vmem [shape: f32[1,32], index: 22, kind: input, shape index: {}]   ;;  %s5579_s23 = inlined_call_operand.vmem [shape: f32[1,32], index: 23, kind: input, shape index: {}]   ;;  %s5580_s24 = inlined_call_operand.vmem [shape: f32[1,32], index: 24, kind: input, shape index: {}]   ;;  %s5581_s25 = inlined_call_operand.vmem [shape: f32[1,32], index: 25, kind: input, shape index: {}]   ;;  %s5582_s26 = inlined_call_operand.vmem [shape: f32[1,32], index: 26, kind: input, shape index: {}]   ;;  %s5583_s27 = inlined_call_operand.hbm [shape: f32[16,32], index: 27, kind: output, shape index: {}]  }
   0x1   :  { %5611 = sst [smem:[#allocation5_spill]] %s5556_s0 }
   0x2   :  { %5612 = sst [smem:[#allocation6_spill]] %s5557_s1 }
   0x3   :  { %5613 = sst [smem:[#allocation7_spill]] %s5558_s2 }
   0x4   :  { %5614 = sst [smem:[#allocation8_spill]] %s5559_s3 }
   0x5   :  { %5615 = sst [smem:[#allocation9_spill]] %s5560_s4 }
   0x6   :  { %5616 = sst [smem:[#allocation10_spill]] %s5561_s5 }
   0x7   :  { %5617 = sst [smem:[#allocation11_spill]] %s5562_s6 }
   0x8   :  { %5618 = sst [smem:[#allocation12_spill]] %s5563_s7 }
   0x9   :  { %5619 = sst [smem:[#allocation13_spill]] %s5564_s8 }
   0xa   :  { %5620 = sst [smem:[#allocation14_spill]] %s5565_s9 }
   0xb   :  { %5621 = sst [smem:[#allocation15_spill]] %s5566_s10 }
   0xc   :  { %5622 = sst [smem:[#allocation16_spill]] %s5567_s11 }
   0xd   :  { %s5623_s8 = sld [smem:[#allocation6_spill]]  ;;  %vm215_vm0 = vcmask 261120   ;;  %s5624_s6 = sld [smem:[#allocation5_spill]] }
  0x13   :  { %v204_v0 = vld [vmem:[%s5623_s8] sm:$0xff]  ;;  %v205_v1 = vld [vmem:[%s5623_s8 + $0x8] sm:$0xff]  ;;  %v206_v2 = vld [vmem:[%s5623_s8 + $0x10] sm:$0xff] }
  0x14   :  { %v4461_v3 = vpack.c.bf16 %v205_v1, %v204_v0  ;;  %v207_v4 = vld [vmem:[%s5623_s8 + $0x18] sm:$0xff]  ;;  %v4880_v5 = vld [vmem:[%s5624_s6] sm:$0xff] }
  0x15   :  { %v4465_v6 = vpack.c.bf16 %v207_v4, %v206_v2  ;;  %4173 = vmatprep.mubr.msk.f32.mxu1 %vm215_vm0, %v4880_v5 }
  0x16   :  { %32 = vsyncpa [#allocation3], 0  ;;  %4462 = vmatprep.subr.bf16.mxu1 %v4461_v3  ;;  %v4887_v7 = vld [vmem:[%s5624_s6 + $0x8] sm:$0xff]  ;;  %v4707_v8 = vmov 0.0   ;;  %vm4708_vm1 = vmmov 0   ;;  %s5625_s4 = sld [smem:[#allocation7_spill]]  ;;  %v87_v28 = vlaneseq }
  0x17   :  { %4464 = vmatpush3.bf16.msra.mxu1 %v4461_v3  ;;  %4186 = vmatprep.subr.mxu0 %v4707_v8  ;;  %s4709_s8 = smov 88   ;;  %s4710_s30 = smov 96   ;;  %vm300_vm2 = vcmask 64512   ;;  %vm1341_vm11 = vcmask 130048   ;;  %vm1343_vm12 = vcmask 195584  }
  0x18   :  { %4466 = vmatprep.subr.bf16.mxu1 %v4465_v6  ;;  %4188 = vmatprep.mubr.msk.f32.mxu0 %vm4708_vm1, %v4707_v8  ;;  %s5609_s9 = smov 120   ;;  %s5605_s5 = smov 80   ;;  %v88_v29 = vshrl.u32 %v87_v28, 7  ;;  %v97_v30 = vand.u32 127, %v87_v28 }
  0x19   :  { %s4713_s28 = smov 112   ;;  %s5597_s0 = smov 72  }
  0x1a   :  { %s5607_s10 = smov 104   ;;  %v102_v31 = vand.u32 7, %v88_v29  ;;  %v89_v32 = vadd.s32 8, %v88_v29  ;;  %v90_v33 = vadd.s32 16, %v88_v29  ;;  %v91_v37 = vadd.s32 24, %v88_v29  ;;  %s5595_s29 = smov 64  }
  0x1b   :  { %4468 = vmatpush3.bf16.msra.mxu1 %v4465_v6  ;;  %v92_v41 = vadd.s32 32, %v88_v29  ;;  %v93_v47 = vadd.s32 40, %v88_v29  ;;  %v95_v0 = vadd.s32 56, %v88_v29  ;;  %v94_v1 = vadd.s32 48, %v88_v29  ;;  %s5593_s1 = smov 48   ;;  %s5589_s6 = smov 56  }
  0x1c   :  { %4176 = vmatprep.subr.mxu1 %v4707_v8  ;;  %v3951_v9 = vld [vmem:[%s5625_s4] ss:$0 sm:$0xff]  ;;  %vm4974_vm3 = vcmp.le.s32.totalorder %v97_v30, %v102_v31  ;;  %v109_v36 = vand.u32 7, %v89_v32  ;;  %v116_v40 = vand.u32 7, %v90_v33  ;;  %v123_v46 = vand.u32 7, %v91_v37  ;;  %s5591_s11 = smov 40  }
  0x1d   :  { %v130_v52 = vand.u32 7, %v92_v41  ;;  %v137_v59 = vand.u32 7, %v93_v47  ;;  %s5642_s7 = sld [smem:[#allocation8_spill]]  ;;  %s5603_s2 = smov 8  }
  0x1e   :  { %4174 = vmatmul.mubr.msk.f32.vlgmr.msra.gmra.mrb[0].mxu1 %vm215_vm0, %v4887_v7  ;;  %vm4984_vm4 = vcmp.le.s32.totalorder %v97_v30, %v109_v36  ;;  %vm4988_vm5 = vcmp.le.s32.totalorder %v97_v30, %v116_v40  ;;  %vm5002_vm6 = vcmp.le.s32.totalorder %v97_v30, %v123_v46  ;;  %s5644_s4 = sld [smem:[#allocation12_spill]]  ;;  %s5660_s3 = smov 16  }
  0x1f   :  { %4178 = vmatprep.mubr.msk.f32.mxu1 %vm4708_vm1, %v4707_v8  ;;  %vm5008_vm7 = vcmp.le.s32.totalorder %v97_v30, %v130_v52  ;;  %vm5016_vm8 = vcmp.le.s32.totalorder %v97_v30, %v137_v59 }
  0xf1   :  { %v4175_v10 = vpop.f32.mrb[0].mxu1 }
  0xf2   :  { %v4900_v11 = vadd.f32 %v4175_v10, %v3951_v9  ;;  %v288_v12 = vpop.f32.mrb[1].mxu1 }
  0xf3   :  { %v4906_v13 = vadd.f32 %v3951_v9, %v288_v12 }
  0xf4   :  { %688 = vrot.lane.b32.xlu0 %v4900_v11, %s4709_s8  ;;  %610 = vrot.lane.b32.xlu1 %v4900_v11, %s4710_s30 }
  0xf8   :  { %375 = vrot.lane.b32.xlu1 %v4906_v13, %s5609_s9  ;;  %298 = vrot.lane.b32.xlu0 %v4906_v13, %s4710_s30 }
  0xfc   :  { %455 = vrot.lane.b32.xlu1 %v4906_v13, %s5605_s5  ;;  %377 = vrot.lane.b32.xlu0 %v4906_v13, %s4709_s8 }
 0x100   :  { %453 = vrot.lane.b32.xlu1 %v4906_v13, %s4713_s28  ;;  %533 = vrot.lane.b32.xlu0 %v4906_v13, %s5597_s0 }
 0x104   :  { %686 = vrot.lane.b32.xlu1 %v4900_v11, %s5609_s9  ;;  %531 = vrot.lane.b32.xlu0 %v4906_v13, %s5607_s10  ;;  %s5652_s9 = smov 104  }
 0x108   :  { %844 = vrot.lane.b32.xlu1 %v4900_v11, %s5597_s0  ;;  %766 = vrot.lane.b32.xlu0 %v4900_v11, %s5605_s5  ;;  %s5645_s5 = sld [smem:[#allocation14_spill]]  ;;  %s5659_s0 = smov 8  }
 0x10c   :  { %842 = vrot.lane.b32.xlu1 %v4900_v11, %s5607_s10  ;;  %764 = vrot.lane.b32.xlu0 %v4900_v11, %s4713_s28  ;;  %s5654_s10 = smov 72  }
 0x166   :  { %v689_v14 = vpop.permute.xlu0 %688  ;;  %v611_v15 = vpop.permute.xlu1 %610 }
 0x16a   :  { %v376_v16 = vpop.permute.xlu1 %375  ;;  %v299_v17 = vpop.permute.xlu0 %298 }
 0x16b   :  { %4177 = vmatpush3.xpose.msk.msra.mxu1 %vm300_vm2, %v299_v17  ;;  %v151_v17 = vand.u32 7, %v95_v0 }
 0x16c   :  { %4181 = vmatprep.subr.mxu1 %v4707_v8 }
 0x16d   :  { %vm5025_vm9 = vcmp.le.s32.totalorder %v97_v30, %v151_v17 }
 0x16e   :  { %v456_v18 = vpop.permute.xlu1 %455  ;;  %4179 = vmatmul.mubr.msk.f32.vlgmr.msra.gmra.mrb[2].mxu1 %vm300_vm2, %v4906_v13  ;;  %v378_v19 = vpop.permute.xlu0 %377 }
 0x16f   :  { %4182 = vmatpush3.xpose.msk.msra.mxu1 %vm300_vm2, %v378_v19  ;;  %4187 = vmatpush3.xpose.msk.msra.mxu0 %vm300_vm2, %v456_v18  ;;  %v144_v18 = vand.u32 7, %v94_v1 }
 0x170   :  { %4183 = vmatprep.mubr.msk.f32.mxu1 %vm4708_vm1, %v4707_v8  ;;  %4196 = vmatprep.subr.mxu0 %v4707_v8 }
 0x171   :  { %4191 = vmatprep.subr.mxu1 %v4707_v8  ;;  %vm5029_vm10 = vcmp.le.s32.totalorder %v97_v30, %v144_v18 }
 0x172   :  { %v454_v20 = vpop.permute.xlu1 %453  ;;  %4184 = vmatmul.mubr.msk.f32.vlgmr.msra.gmra.mrb[4].mxu1 %vm300_vm2, %v376_v16  ;;  %v534_v21 = vpop.permute.xlu0 %533 }
 0x173   :  { %4189 = vmatmul.mubr.msk.f32.vlgmr.msra.gmra.mrb[0].mxu0 %vm300_vm2, %v454_v20  ;;  %4192 = vmatpush3.xpose.msk.msra.mxu1 %vm300_vm2, %v534_v21 }
 0x174   :  { %4197 = vmatpush3.xpose.msk.msra.mxu0 %vm300_vm2, %v611_v15  ;;  %4198 = vmatprep.mubr.msk.f32.mxu0 %vm4708_vm1, %v4707_v8 }
 0x175   :  { %4193 = vmatprep.mubr.msk.f32.mxu1 %vm4708_vm1, %v4707_v8  ;;  %4201 = vmatprep.subr.mxu1 %v4707_v8 }
 0x176   :  { %v687_v22 = vpop.permute.xlu1 %686  ;;  %v532_v23 = vpop.permute.xlu0 %531  ;;  %4206 = vmatprep.subr.mxu0 %v4707_v8 }
 0x177   :  { %4194 = vmatmul.mubr.msk.f32.vlgmr.msra.gmra.mrb[6].mxu1 %vm300_vm2, %v532_v23  ;;  %4199 = vmatmul.mubr.msk.f32.vlgmr.msra.gmra.mrb[2].mxu0 %vm300_vm2, %v4900_v11 }
 0x178   :  { %4202 = vmatpush3.xpose.msk.msra.mxu1 %vm300_vm2, %v689_v14  ;;  %4203 = vmatprep.mubr.msk.f32.mxu1 %vm4708_vm1, %v4707_v8 }
 0x179   :  { %4211 = vmatprep.subr.mxu1 %v4707_v8  ;;  %4208 = vmatprep.mubr.msk.f32.mxu0 %vm4708_vm1, %v4707_v8 }
 0x17a   :  { %v845_v24 = vpop.permute.xlu1 %844  ;;  %v767_v25 = vpop.permute.xlu0 %766 }
 0x17b   :  { %4204 = vmatmul.mubr.msk.f32.vlgmr.msra.gmra.mrb[8].mxu1 %vm300_vm2, %v687_v22  ;;  %4207 = vmatpush3.xpose.msk.msra.mxu0 %vm300_vm2, %v767_v25 }
 0x17c   :  { %4212 = vmatpush3.xpose.msk.msra.mxu1 %vm300_vm2, %v845_v24  ;;  %4213 = vmatprep.mubr.msk.f32.mxu1 %vm4708_vm1, %v4707_v8 }
 0x17d   :  { %4216 = vmatprep.subr.mxu0 %v4707_v8  ;;  %4221 = vmatprep.subr.mxu1 %v4707_v8 }
 0x17e   :  { %v843_v26 = vpop.permute.xlu1 %842  ;;  %v765_v27 = vpop.permute.xlu0 %764 }
 0x17f   :  { %4209 = vmatmul.mubr.msk.f32.vlgmr.msra.gmra.mrb[4].mxu0 %vm300_vm2, %v765_v27  ;;  %4214 = vmatmul.mubr.msk.f32.vlgmr.msra.gmra.mrb[10].mxu1 %vm300_vm2, %v843_v26 }
 0x180   :  { %4218 = vmatprep.mubr.msk.f32.mxu0 %vm4708_vm1, %v4707_v8  ;;  %4223 = vmatprep.mubr.msk.f32.mxu1 %vm4708_vm1, %v4707_v8 }
 0x241   :  { %v371_v34 = vpop.f32.mrb[2].mxu1 }
 0x242   :  { %v920_v38 = vmul.f32 0.35355338, %v371_v34  ;;  %v4180_v39 = vpop.f32.mrb[3].mxu1 }
 0x244   :  { %v4980_v42 = vsel %vm4974_vm3, %v920_v38, -1e+30 }
 0x245   :  { %v449_v43 = vpop.f32.mrb[4].mxu1  ;;  %v936_v44 = vsel %vm300_vm2, %v4980_v42, -inf }
 0x246   :  { %v921_v48 = vmul.f32 0.35355338, %v449_v43  ;;  %v4185_v49 = vpop.f32.mrb[5].mxu1  ;;  %v527_v50 = vpop.f32.mrb[0].mxu0  ;;  %937 = vmax.xlane.f32.xlu0 %v936_v44 }
 0x247   :  { %v922_v53 = vmul.f32 0.35355338, %v527_v50  ;;  %v4190_v54 = vpop.f32.mrb[1].mxu0 }
 0x248   :  { %v4994_v55 = vsel %vm4984_vm4, %v921_v48, -1e+30 }
 0x249   :  { %v939_v56 = vsel %vm300_vm2, %v4994_v55, -inf  ;;  %v5000_v57 = vsel %vm4988_vm5, %v922_v53, -1e+30 }
 0x24a   :  { %v605_v60 = vpop.f32.mrb[6].mxu1  ;;  %v682_v61 = vpop.f32.mrb[2].mxu0  ;;  %940 = vmax.xlane.f32.xlu1 %v939_v56  ;;  %v942_v62 = vsel %vm300_vm2, %v5000_v57, -inf }
 0x24b   :  { %v923_v2 = vmul.f32 0.35355338, %v605_v60  ;;  %v924_v3 = vmul.f32 0.35355338, %v682_v61  ;;  %v4195_v4 = vpop.f32.mrb[7].mxu1  ;;  %v4200_v6 = vpop.f32.mrb[3].mxu0  ;;  %943 = vmax.xlane.f32.xlu0 %v942_v62 }
 0x24d   :  { %v931_v9 = vsel %vm5002_vm6, %v923_v2, -1e+30  ;;  %v932_v10 = vsel %vm5008_vm7, %v924_v3, -1e+30 }
 0x24e   :  { %v760_v14 = vpop.f32.mrb[8].mxu1  ;;  %v945_v15 = vsel %vm300_vm2, %v931_v9, -inf  ;;  %v948_v16 = vsel %vm300_vm2, %v932_v10, -inf }
 0x24f   :  { %v925_v19 = vmul.f32 0.35355338, %v760_v14  ;;  %v4205_v20 = vpop.f32.mrb[9].mxu1  ;;  %946 = vmax.xlane.f32.xlu0 %v945_v15  ;;  %949 = vmax.xlane.f32.xlu1 %v948_v16 }
 0x251   :  { %v933_v21 = vsel %vm5016_vm8, %v925_v19, -1e+30 }
 0x252   :  { %v838_v22 = vpop.f32.mrb[4].mxu0  ;;  %v916_v23 = vpop.f32.mrb[10].mxu1  ;;  %v951_v24 = vsel %vm300_vm2, %v933_v21, -inf }
 0x253   :  { %v926_v27 = vmul.f32 0.35355338, %v838_v22  ;;  %v927_v28 = vmul.f32 0.35355338, %v916_v23  ;;  %v4210_v29 = vpop.f32.mrb[5].mxu0  ;;  %v4215_v31 = vpop.f32.mrb[11].mxu1  ;;  %952 = vmax.xlane.f32.xlu0 %v951_v24 }
 0x255   :  { %v935_v32 = vsel %vm5025_vm9, %v927_v28, -1e+30  ;;  %v934_v33 = vsel %vm5029_vm10, %v926_v27, -1e+30 }
 0x256   :  { %v957_v34 = vsel %vm300_vm2, %v935_v32, -inf  ;;  %v954_v36 = vsel %vm300_vm2, %v934_v33, -inf }
 0x257   :  { %958 = vmax.xlane.f32.xlu0 %v957_v34  ;;  %955 = vmax.xlane.f32.xlu1 %v954_v36 }
 0x268   :  { %1024 = vrot.lane.b32.xlu1 %v4906_v13, %s5595_s29 }
 0x26c   :  { %1176 = vrot.lane.b32.xlu1 %v4906_v13, %s5593_s1 }
 0x26d   :  { %1100 = vrot.lane.b32.xlu0 %v4906_v13, %s5589_s6 }
 0x270   :  { %1252 = vrot.lane.b32.xlu1 %v4906_v13, %s5591_s11 }
 0x271   :  { %1345 = vrot.lane.b32.xlu0 %v4900_v11, %s5595_s29  ;;  %s4723_s29 = smov [#allocation2]  }
 0x274   :  { %1421 = vrot.lane.b32.xlu1 %v4900_v11, %s5589_s6  ;;  %s5601_s6 = smov 16  }
 0x2d3   :  { %v938_v30 = vpop.xlane.xlu0 %937 }
 0x2d4   :  { %v960_v37 = vsub.f32 %v4980_v42, %v938_v30 }
 0x2d6   :  { %v968_v38 = vmul.f32 1.442695, %v960_v37 }
 0x2d7   :  { %v941_v39 = vpop.xlane.xlu1 %940 }
 0x2d8   :  { %4591 = vpow2.f32 %v968_v38  ;;  %v961_v40 = vsub.f32 %v4994_v55, %v941_v39  ;;  %v944_v41 = vpop.xlane.xlu0 %943 }
 0x2d9   :  { %v962_v43 = vsub.f32 %v5000_v57, %v944_v41 }
 0x2da   :  { %v970_v44 = vmul.f32 1.442695, %v961_v40 }
 0x2db   :  { %v972_v46 = vmul.f32 1.442695, %v962_v43 }
 0x2dc   :  { %4593 = vpow2.f32 %v970_v44  ;;  %v947_v13 = vpop.xlane.xlu0 %946  ;;  %v950_v47 = vpop.xlane.xlu1 %949 }
 0x2dd   :  { %4595 = vpow2.f32 %v972_v46  ;;  %v963_v48 = vsub.f32 %v931_v9, %v947_v13  ;;  %v964_v49 = vsub.f32 %v932_v10, %v950_v47 }
 0x2df   :  { %v974_v50 = vmul.f32 1.442695, %v963_v48  ;;  %v976_v52 = vmul.f32 1.442695, %v964_v49 }
 0x2e0   :  { %v953_v53 = vpop.xlane.xlu0 %952 }
 0x2e1   :  { %4597 = vpow2.f32 %v974_v50  ;;  %v965_v42 = vsub.f32 %v933_v21, %v953_v53 }
 0x2e2   :  { %v4592_v54 = vpop.eup %4591  ;;  %4599 = vpow2.f32 %v976_v52 }
 0x2e3   :  { %v978_v56 = vmul.f32 1.442695, %v965_v42  ;;  %v984_v55 = vsel %vm300_vm2, %v4592_v54, 0.0 }
 0x2e4   :  { %v959_v59 = vpop.xlane.xlu0 %958  ;;  %985 = vadd.xlane.f32.xlu1 %v984_v55  ;;  %v956_v57 = vpop.xlane.xlu1 %955  ;;  %v1664_v55 = vld [vmem:[%s5642_s7] sm:$0xff] }
 0x2e5   :  { %4601 = vpow2.f32 %v978_v56  ;;  %v967_v60 = vsub.f32 %v935_v32, %v959_v59  ;;  %v966_v61 = vsub.f32 %v934_v33, %v956_v57  ;;  %v1665_v59 = vld [vmem:[%s5642_s7 + $0x8] sm:$0xff] }
 0x2e6   :  { %v4594_v62 = vpop.eup %4593  ;;  %v4469_v57 = vpack.c.bf16 %v1665_v59, %v1664_v55  ;;  %v1805_v59 = vld [vmem:[%s5644_s4 + $0x10] sm:$0xff] }
 0x2e7   :  { %v4596_v0 = vpop.eup %4595  ;;  %v982_v1 = vmul.f32 1.442695, %v967_v60  ;;  %v980_v2 = vmul.f32 1.442695, %v966_v61  ;;  %v987_v3 = vsel %vm300_vm2, %v4594_v62, 0.0 }
 0x2e8   :  { %v1101_v4 = vpop.permute.xlu0 %1100  ;;  %988 = vadd.xlane.f32.xlu0 %v987_v3  ;;  %v1025_v6 = vpop.permute.xlu1 %1024  ;;  %v990_v9 = vsel %vm300_vm2, %v4596_v0, 0.0 }
 0x2e9   :  { %4603 = vpow2.f32 %v982_v1  ;;  %4222 = vmatpush3.msra.mxu1 %v1101_v4  ;;  %991 = vadd.xlane.f32.xlu1 %v990_v9 }
 0x2ea   :  { %4605 = vpow2.f32 %v980_v2  ;;  %4217 = vmatpush3.msra.mxu0 %v1025_v6  ;;  %4231 = vmatprep.subr.mxu1 %v4707_v8 }
 0x2eb   :  { %v4598_v10 = vpop.eup %4597  ;;  %4226 = vmatprep.subr.mxu0 %v4707_v8 }
 0x2ec   :  { %v4600_v14 = vpop.eup %4599  ;;  %v993_v15 = vsel %vm300_vm2, %v4598_v10, 0.0  ;;  %v1177_v23 = vpop.permute.xlu1 %1176 }
 0x2ed   :  { %994 = vadd.xlane.f32.xlu0 %v993_v15  ;;  %v996_v16 = vsel %vm300_vm2, %v4600_v14, 0.0  ;;  %v1346_v28 = vpop.permute.xlu0 %1345 }
 0x2ee   :  { %997 = vadd.xlane.f32.xlu1 %v996_v16 }
 0x2ef   :  { %v4602_v17 = vpop.eup %4601 }
 0x2f0   :  { %v999_v18 = vsel %vm300_vm2, %v4602_v17, 0.0  ;;  %v1253_v24 = vpop.permute.xlu1 %1252 }
 0x2f1   :  { %1000 = vadd.xlane.f32.xlu0 %v999_v18 }
 0x2f3   :  { %v5062_v19 = vpop.eup %4603 }
 0x2f4   :  { %v5064_v20 = vpop.eup %4605  ;;  %v1005_v21 = vsel %vm300_vm2, %v5062_v19, 0.0  ;;  %v1422_v27 = vpop.permute.xlu1 %1421 }
 0x2f5   :  { %1006 = vadd.xlane.f32.xlu0 %v1005_v21  ;;  %v1002_v22 = vsel %vm300_vm2, %v5064_v20, 0.0 }
 0x2f6   :  { %1003 = vadd.xlane.f32.xlu1 %v1002_v22 }
 0x307   :  { %1573 = vrot.lane.b32.xlu1 %v4900_v11, %s5591_s11  ;;  %s5643_s11 = sld [smem:[#allocation9_spill]] }
 0x30b   :  { %1497 = vrot.lane.b32.xlu0 %v4900_v11, %s5593_s1  ;;  %s5599_s1 = smov 24  }
 0x371   :  { %v986_v29 = vpop.xlane.xlu1 %985 }
 0x372   :  { %4607 = vrcp.f32 %v986_v29 }
 0x375   :  { %v989_v31 = vpop.xlane.xlu0 %988 }
 0x376   :  { %4609 = vrcp.f32 %v989_v31  ;;  %v992_v32 = vpop.xlane.xlu1 %991 }
 0x377   :  { %4611 = vrcp.f32 %v992_v32 }
 0x37a   :  { %v995_v33 = vpop.xlane.xlu0 %994 }
 0x37b   :  { %4613 = vrcp.f32 %v995_v33  ;;  %v998_v34 = vpop.xlane.xlu1 %997 }
 0x37c   :  { %v4608_v36 = vpop.eup %4607  ;;  %4615 = vrcp.f32 %v998_v34 }
 0x37d   :  { %v1009_v30 = vmul.f32 %v4608_v36, %v4592_v54 }
 0x37e   :  { %v1001_v37 = vpop.xlane.xlu0 %1000 }
 0x37f   :  { %4617 = vrcp.f32 %v1001_v37  ;;  %4219 = vmatmul.mubr.msk.f32.vlgmr.msra.gmra.mrb[6].mxu0 %vm300_vm2, %v1009_v30  ;;  %v3978_v37 = vld [vmem:[%s5643_s11] ss:$0 sm:$0xff]  ;;  %s5648_s11 = sld [smem:[#allocation13_spill]] }
 0x380   :  { %v4610_v11 = vpop.eup %4609  ;;  %4227 = vmatpush3.msra.mxu0 %v1177_v23  ;;  %4228 = vmatprep.mubr.msk.f32.mxu0 %vm4708_vm1, %v4707_v8 }
 0x381   :  { %v4612_v38 = vpop.eup %4611  ;;  %v1011_v39 = vmul.f32 %v4610_v11, %v4594_v62  ;;  %4236 = vmatprep.subr.mxu0 %v4707_v8  ;;  %v1666_v62 = vld [vmem:[%s5642_s7 + $0x10] sm:$0xff] }
 0x382   :  { %v1013_v40 = vmul.f32 %v4612_v38, %v4596_v0  ;;  %v1007_v41 = vpop.xlane.xlu0 %1006  ;;  %v1667_v0 = vld [vmem:[%s5642_s7 + $0x18] sm:$0xff]  ;;  %s5646_s7 = sld [smem:[#allocation10_spill]] }
 0x383   :  { %4619 = vrcp.f32 %v1007_v41  ;;  %v1004_v43 = vpop.xlane.xlu1 %1003  ;;  %4224 = vmatmul.mubr.msk.f32.vlgmr.msra.gmra.mrb[12].mxu1 %vm300_vm2, %v1011_v39  ;;  %v4473_v1 = vpack.c.bf16 %v1667_v0, %v1666_v62  ;;  %v1906_v62 = vld [vmem:[%s5645_s5 + $0x8] sm:$0xff]  ;;  %v1907_v0 = vld [vmem:[%s5645_s5 + $0x10] sm:$0xff] }
 0x384   :  { %4621 = vrcp.f32 %v1004_v43  ;;  %4232 = vmatpush3.msra.mxu1 %v1253_v24  ;;  %4229 = vmatmul.mubr.msk.f32.vlgmr.msra.gmra.mrb[8].mxu0 %vm300_vm2, %v1013_v40 }
 0x385   :  { %v4614_v44 = vpop.eup %4613  ;;  %4237 = vmatpush3.msra.mxu0 %v1346_v28  ;;  %4233 = vmatprep.mubr.msk.f32.mxu1 %vm4708_vm1, %v4707_v8 }
 0x386   :  { %v4616_v46 = vpop.eup %4615  ;;  %v1015_v13 = vmul.f32 %v4614_v44, %v4598_v10  ;;  %4238 = vmatprep.mubr.msk.f32.mxu0 %vm4708_vm1, %v4707_v8  ;;  %4241 = vmatprep.subr.mxu1 %v4707_v8  ;;  %v1498_v48 = vpop.permute.xlu0 %1497 }
 0x387   :  { %v1017_v47 = vmul.f32 %v4616_v46, %v4600_v14  ;;  %4246 = vmatprep.subr.mxu0 %v4707_v8  ;;  %v1574_v52 = vpop.permute.xlu1 %1573 }
 0x388   :  { %4234 = vmatmul.mubr.msk.f32.vlgmr.msra.gmra.mrb[14].mxu1 %vm300_vm2, %v1015_v13 }
 0x389   :  { %v4618_v49 = vpop.eup %4617  ;;  %4239 = vmatmul.mubr.msk.f32.vlgmr.msra.gmra.mrb[10].mxu0 %vm300_vm2, %v1017_v47  ;;  %4242 = vmatpush3.msra.mxu1 %v1422_v27 }
 0x38a   :  { %v1019_v50 = vmul.f32 %v4618_v49, %v4602_v17  ;;  %4247 = vmatpush3.msra.mxu0 %v1498_v48  ;;  %4243 = vmatprep.mubr.msk.f32.mxu1 %vm4708_vm1, %v4707_v8 }
 0x38b   :  { %4251 = vmatprep.subr.mxu1 %v4707_v8  ;;  %4248 = vmatprep.mubr.msk.f32.mxu0 %vm4708_vm1, %v4707_v8 }
 0x38c   :  { %4244 = vmatmul.mubr.msk.f32.vlgmr.msra.gmra.mrb[16].mxu1 %vm300_vm2, %v1019_v50 }
 0x38d   :  { %v4620_v53 = vpop.eup %4619  ;;  %4252 = vmatpush3.msra.mxu1 %v1574_v52  ;;  %4253 = vmatprep.mubr.msk.f32.mxu1 %vm4708_vm1, %v4707_v8 }
 0x38e   :  { %v4622_v42 = vpop.eup %4621  ;;  %v1023_v54 = vmul.f32 %v4620_v53, %v5062_v19  ;;  %4470 = vmatprep.subr.bf16.mxu1 %v4469_v57 }
 0x38f   :  { %v1021_v56 = vmul.f32 %v4622_v42, %v5064_v20 }
 0x390   :  { %4254 = vmatmul.mubr.msk.f32.vlgmr.msra.gmra.mrb[18].mxu1 %vm300_vm2, %v1023_v54 }
 0x391   :  { %4249 = vmatmul.mubr.msk.f32.vlgmr.msra.gmra.mrb[12].mxu0 %vm300_vm2, %v1021_v56  ;;  %4472 = vmatpush3.bf16.msra.mxu1 %v4469_v57  ;;  %v1804_v56 = vld [vmem:[%s5644_s4 + $0x8] sm:$0xff]  ;;  %v1806_v57 = vld [vmem:[%s5644_s4 + $0x18] sm:$0xff] }
 0x392   :  { %4474 = vmatprep.subr.bf16.mxu1 %v4473_v1 }
 0x395   :  { %4476 = vmatpush3.bf16.msra.mxu1 %v4473_v1 }
 0x452   :  { %v1096_v60 = vpop.f32.mrb[6].mxu0 }
 0x453   :  { %v4220_v61 = vpop.f32.mrb[7].mxu0 }
 0x454   :  { %v1905_v61 = vld [vmem:[%s5645_s5] sm:$0xff] }
 0x455   :  { %v4485_v1 = vpack.c.bf16 %v1906_v62, %v1905_v61 }
 0x456   :  { %v1172_v2 = vpop.f32.mrb[12].mxu1 }
 0x457   :  { %1329 = vrot.lane.b32.xlu0 %v1172_v2, %s5603_s2  ;;  %v4225_v3 = vpop.f32.mrb[13].mxu1  ;;  %v1248_v4 = vpop.f32.mrb[8].mxu0  ;;  %v1908_v2 = vld [vmem:[%s5645_s5 + $0x18] sm:$0xff]  ;;  %4486 = vmatprep.subr.bf16.mxu0 %v4485_v1 }
 0x458   :  { %1333 = vrot.lane.b32.xlu1 %v1248_v4, %s5601_s6  ;;  %v4230_v6 = vpop.f32.mrb[9].mxu0  ;;  %v4489_v3 = vpack.c.bf16 %v1908_v2, %v1907_v0  ;;  %v1909_v4 = vld [vmem:[%s5645_s5 + $0x20] sm:$0xff]  ;;  %4488 = vmatpush3.bf16.msra.mxu0 %v4485_v1 }
 0x459   :  { %v1910_v6 = vld [vmem:[%s5645_s5 + $0x28] sm:$0xff] }
 0x45a   :  { %4490 = vmatprep.subr.bf16.mxu0 %v4489_v3 }
 0x45b   :  { %v1324_v9 = vpop.f32.mrb[14].mxu1 }
 0x45c   :  { %v1417_v10 = vpop.f32.mrb[10].mxu0  ;;  %v4235_v14 = vpop.f32.mrb[15].mxu1  ;;  %1337 = vrot.lane.b32.xlu1 %v1324_v9, %s5599_s1  ;;  %v4493_v9 = vpack.c.bf16 %v1910_v6, %v1909_v4  ;;  %4492 = vmatpush3.bf16.msra.mxu0 %v4489_v3 }
 0x45d   :  { %v4240_v15 = vpop.f32.mrb[11].mxu0 }
 0x45e   :  { %4494 = vmatprep.subr.bf16.mxu0 %v4493_v9 }
 0x45f   :  { %v1493_v16 = vpop.f32.mrb[16].mxu1 }
 0x460   :  { %1650 = vrot.lane.b32.xlu0 %v1493_v16, %s5603_s2  ;;  %v4245_v17 = vpop.f32.mrb[17].mxu1  ;;  %4496 = vmatpush3.bf16.msra.mxu0 %v4493_v9  ;;  %s5650_s2 = sld [smem:[#allocation16_spill]] }
 0x463   :  { %v1645_v18 = vpop.f32.mrb[18].mxu1 }
 0x464   :  { %v1569_v19 = vpop.f32.mrb[12].mxu0  ;;  %1658 = vrot.lane.b32.xlu1 %v1645_v18, %s5599_s1  ;;  %v4255_v20 = vpop.f32.mrb[19].mxu1  ;;  %s5647_s1 = sld [smem:[#allocation11_spill]] }
 0x465   :  { %1654 = vrot.lane.b32.xlu0 %v1569_v19, %s5601_s6  ;;  %v4250_v21 = vpop.f32.mrb[13].mxu0  ;;  %v3981_v20 = vld [vmem:[%s5646_s7] ss:$0 sm:$0xff]  ;;  %s5649_s6 = sld [smem:[#allocation15_spill]]  ;;  %s5658_s7 = smov 56  }
 0x46b   :  { %v3986_v61 = vld [vmem:[%s5649_s6] ss:$0 sm:$0xff] }
 0x4c9   :  { %v1330_v22 = vpop.permute.xlu0 %1329 }
 0x4ca   :  { %v1334_v23 = vpop.permute.xlu1 %1333  ;;  %v1340_v24 = vsel %vm300_vm2, %v1096_v60, %v1330_v22  ;;  %v4481_v60 = vpack.c.bf16 %v1806_v57, %v1805_v59  ;;  %v3982_v22 = vld [vmem:[%s5647_s1] ss:$0 sm:$0xff]  ;;  %s3940_s1 = sshll.u32 %s4723_s29, 4  ;;  %s3941_s1 = int_to_ptr.vmem [resolvable:$true] %s3940_s1 }
 0x4cb   :  { %v1342_v27 = vsel %vm1341_vm11, %v1340_v24, %v1334_v23  ;;  %p4688_p1 = scmp.lt.s32.totalorder %s3941_s1, %s3941_s1 }
 0x4ce   :  { %v1338_v28 = vpop.permute.xlu1 %1337 }
 0x4cf   :  { %v1344_v29 = vsel %vm1343_vm12, %v1342_v27, %v1338_v28 }
 0x4d0   :  { %4264 = vmatprep.mubr.msk.f32.mxu1 %vm215_vm0, %v1344_v29 }
 0x4d2   :  { %v1651_v31 = vpop.permute.xlu0 %1650 }
 0x4d3   :  { %v1661_v33 = vsel %vm300_vm2, %v1417_v10, %v1651_v31 }
 0x4d6   :  { %v1659_v32 = vpop.permute.xlu1 %1658 }
 0x4d7   :  { %v1655_v34 = vpop.permute.xlu0 %1654 }
 0x4d8   :  { %v1662_v36 = vsel %vm1341_vm11, %v1661_v33, %v1655_v34  ;;  %v1912_v33 = vld [vmem:[%s5645_s5 + $0x38] sm:$0xff] }
 0x4d9   :  { %v1663_v30 = vsel %vm1343_vm12, %v1662_v36, %v1659_v32  ;;  %v1911_v32 = vld [vmem:[%s5645_s5 + $0x30] sm:$0xff]  ;;  %v1913_v36 = vld [vmem:[%s5645_s5 + $0x40] sm:$0xff] }
 0x4da   :  { %4265 = vmatmul.mubr.msk.f32.vlgmr.msra.gmra.mrb[20].mxu1 %vm215_vm0, %v1663_v30  ;;  %v4497_v34 = vpack.c.bf16 %v1912_v33, %v1911_v32  ;;  %v1914_v30 = vld [vmem:[%s5645_s5 + $0x48] sm:$0xff] }
 0x4dc   :  { %4498 = vmatprep.subr.bf16.mxu0 %v4497_v34 }
 0x4dd   :  { %4500 = vmatpush3.bf16.msra.mxu0 %v4497_v34 }
 0x5ad   :  { %v4266_v11 = vpop.f32.mrb[20].mxu1 }
 0x5ae   :  { %v1753_v38 = vadd.f32 %v4266_v11, %v3978_v37  ;;  %v1747_v39 = vpop.f32.mrb[21].mxu1  ;;  %v1915_v11 = vld [vmem:[%s5645_s5 + $0x50] sm:$0xff] }
 0x5af   :  { %v1748_v40 = vadd.f32 %v3978_v37, %v1747_v39  ;;  %v4501_v37 = vpack.c.bf16 %v1914_v30, %v1913_v36 }
 0x5b0   :  { %v1757_v41 = vadd.f32 %v1753_v38, %v4887_v7  ;;  %v1916_v38 = vld [vmem:[%s5645_s5 + $0x58] sm:$0xff] }
 0x5b1   :  { %v1756_v43 = vadd.f32 %v1748_v40, %v4880_v5  ;;  %v1803_v5 = vld [vmem:[%s5644_s4] sm:$0xff]  ;;  %4502 = vmatprep.subr.bf16.mxu0 %v4501_v37  ;;  %v4505_v39 = vpack.c.bf16 %v1916_v38, %v1915_v11 }
 0x5b2   :  { %v1763_v44 = vsel %vm215_vm0, %v1757_v41, 0.0  ;;  %v4477_v55 = vpack.c.bf16 %v1804_v56, %v1803_v5  ;;  %4504 = vmatpush3.bf16.msra.mxu0 %v4501_v37  ;;  %v1917_v40 = vld [vmem:[%s5645_s5 + $0x60] sm:$0xff] }
 0x5b3   :  { %1764 = vadd.xlane.f32.xlu1 %v1763_v44  ;;  %v1760_v46 = vsel %vm215_vm0, %v1756_v43, 0.0  ;;  %4506 = vmatprep.subr.bf16.mxu0 %v4505_v39  ;;  %v1919_v44 = vld [vmem:[%s5645_s5 + $0x70] sm:$0xff]  ;;  %v3987_v38 = vld [vmem:[%s5650_s2] ss:$0 sm:$0xff] }
 0x5b4   :  { %1761 = vadd.xlane.f32.xlu0 %v1760_v46  ;;  %4478 = vmatprep.subr.bf16.mxu1 %v4477_v55  ;;  %v1920_v46 = vld [vmem:[%s5645_s5 + $0x78] sm:$0xff] }
 0x5b5   :  { %4480 = vmatpush3.bf16.msra.mxu1 %v4477_v55 }
 0x5b6   :  { %4482 = vmatprep.subr.bf16.mxu1 %v4481_v60  ;;  %4508 = vmatpush3.bf16.msra.mxu0 %v4505_v39 }
 0x5b9   :  { %4484 = vmatpush3.bf16.msra.mxu1 %v4481_v60 }
 0x640   :  { %v1765_v13 = vpop.xlane.xlu1 %1764 }
 0x641   :  { %v1768_v47 = vmul.f32 0.03125, %v1765_v13  ;;  %v1762_v48 = vpop.xlane.xlu0 %1761  ;;  %v4513_v13 = vpack.c.bf16 %v1920_v46, %v1919_v44 }
 0x642   :  { %v1767_v49 = vmul.f32 0.03125, %v1762_v48 }
 0x643   :  { %v1770_v50 = vsub.f32 %v1757_v41, %v1768_v47  ;;  %v1918_v41 = vld [vmem:[%s5645_s5 + $0x68] sm:$0xff]  ;;  %v3983_v47 = vld [vmem:[%s5648_s11] ss:$0 sm:$0xff]  ;;  %s4683_s11 = scalar_lea.vmem %s3941_s1, 256 }
 0x644   :  { %v1769_v52 = vsub.f32 %v1756_v43, %v1767_v49  ;;  %v4509_v43 = vpack.c.bf16 %v1918_v41, %v1917_v40  ;;  %p4684_p0 = scmp.ne.s32.totalorder %s3941_s1, %s4683_s11  ;;  %p4689_p2 = scmp.lt.s32.totalorder %s4683_s11, %s4683_s11 }
 0x645   :  { %v1772_v54 = vmul.f32 %v1770_v50, %v1770_v50 }
 0x646   :  { %v1771_v53 = vmul.f32 %v1769_v52, %v1769_v52  ;;  %4510 = vmatprep.subr.bf16.mxu0 %v4509_v43  ;;  %p4690_p3 = por %p4689_p2, %p4688_p1 }
 0x647   :  { %v1776_v7 = vsel %vm215_vm0, %v1772_v54, 0.0  ;;  %4512 = vmatpush3.bf16.msra.mxu0 %v4509_v43  ;;  %v3988_v43 = vld [vmem:[%s5568_s12] ss:$0 sm:$0xff]  ;;  %s5651_s12 = smov 120  }
 0x648   :  { %v1773_v42 = vsel %vm215_vm0, %v1771_v53, 0.0  ;;  %4514 = vmatprep.subr.bf16.mxu0 %v4513_v13  ;;  %p4691_p4 = pnand %p4690_p3, %p4684_p0 }
 0x649   :  { %1774 = vadd.xlane.f32.xlu0 %v1773_v42 }
 0x64b   :  { %4516 = vmatpush3.bf16.msra.mxu0 %v4513_v13 }
 0x64c   :  { %4354 = vmatprep.subr.mxu0 %v4707_v8 }
 0x64d   :  { %1777 = vadd.xlane.f32.xlu0 %v1776_v7 }
 0x6d6   :  { %v1775_v10 = vpop.xlane.xlu0 %1774 }
 0x6d7   :  { %v1779_v14 = vmul.f32 0.03125, %v1775_v10 }
 0x6d9   :  { %v1781_v15 = vadd.f32 1e-05, %v1779_v14 }
 0x6da   :  { %v1778_v16 = vpop.xlane.xlu0 %1777 }
 0x6db   :  { %4623 = vrsqrt.f32 %v1781_v15  ;;  %v1780_v17 = vmul.f32 0.03125, %v1778_v16 }
 0x6dd   :  { %v1782_v18 = vadd.f32 1e-05, %v1780_v17 }
 0x6df   :  { %4625 = vrsqrt.f32 %v1782_v18 }
 0x6e5   :  { %v4624_v19 = vpop.eup %4623 }
 0x6e6   :  { %v1785_v21 = vmul.f32 %v4624_v19, %v1769_v52 }
 0x6e8   :  { %v1793_v23 = vmul.f32 %v3981_v20, %v1785_v21 }
 0x6e9   :  { %v4626_v24 = vpop.eup %4625 }
 0x6ea   :  { %v1786_v27 = vmul.f32 %v4626_v24, %v1770_v50  ;;  %v1801_v28 = vadd.f32 %v3982_v22, %v1793_v23  ;;  %v2049_v23 = vld [vmem:[%s5569_s13] sm:$0xff]  ;;  %v2050_v24 = vld [vmem:[%s5569_s13 + $0x8] sm:$0xff] }
 0x6ec   :  { %v1794_v29 = vmul.f32 %v3981_v20, %v1786_v27  ;;  %4275 = vmatprep.mubr.msk.f32.mxu1 %vm215_vm0, %v1801_v28  ;;  %v4517_v27 = vpack.c.bf16 %v2050_v24, %v2049_v23 }
 0x6ee   :  { %v1802_v31 = vadd.f32 %v3982_v22, %v1794_v29  ;;  %v2052_v29 = vld [vmem:[%s5569_s13 + $0x18] sm:$0xff]  ;;  %4518 = vmatprep.subr.bf16.mxu1 %v4517_v27 }
 0x6f0   :  { %4276 = vmatmul.mubr.msk.f32.vlgmr.msra.gmra.mrb[22].mxu1 %vm215_vm0, %v1802_v31 }
 0x6f1   :  { %4520 = vmatpush3.bf16.msra.mxu1 %v4517_v27 }
 0x7c3   :  { %v4277_v48 = vpop.f32.mrb[22].mxu1 }
 0x7c4   :  { %v1892_v49 = vadd.f32 %v4277_v48, %v3983_v47  ;;  %v1886_v50 = vpop.f32.mrb[23].mxu1  ;;  %v3989_v48 = vld [vmem:[%s5570_s14] ss:$0 sm:$0xff]  ;;  %s5653_s14 = smov 80  }
 0x7c5   :  { %v1887_v52 = vadd.f32 %v3983_v47, %v1886_v50 }
 0x7c6   :  { %v1898_v53 = vmul.f32 0.70710677, %v1892_v49  ;;  %v1896_v59 = vmul.f32 0.5, %v1892_v49 }
 0x7c7   :  { %v1897_v42 = vmul.f32 0.70710677, %v1887_v52  ;;  %v1895_v56 = vmul.f32 0.5, %v1887_v52 }
 0x7c8   :  { %4627 = verf.f32 %v1898_v53 }
 0x7c9   :  { %4629 = verf.f32 %v1897_v42 }
 0x7d2   :  { %v4628_v54 = vpop.eup %4627 }
 0x7d3   :  { %v4630_v7 = vpop.eup %4629  ;;  %v1902_v5 = vadd.f32 1.0, %v4628_v54 }
 0x7d4   :  { %v1901_v55 = vadd.f32 1.0, %v4630_v7 }
 0x7d5   :  { %v1904_v60 = vmul.f32 %v1902_v5, %v1896_v59 }
 0x7d6   :  { %v1903_v57 = vmul.f32 %v1901_v55, %v1895_v56 }
 0x7d8   :  { %4310 = vmatprep.mubr.f32.mxu0 %v1903_v57 }
 0x7d9   :  { %4311 = vmatmul.mubr.f32.vlgmr.msra.gmra.mrb[14].mxu0 %v1904_v60 }
 0x7da   :  { %4356 = vmatprep.mubr.msk.f32.mxu0 %vm4708_vm1, %v4707_v8 }
 0x8ac   :  { %v4312_v62 = vpop.f32.mrb[14].mxu0 }
 0x8ad   :  { %v2000_v0 = vadd.f32 %v4312_v62, %v3986_v61  ;;  %v1994_v1 = vpop.f32.mrb[15].mxu0 }
 0x8ae   :  { %v1995_v2 = vadd.f32 %v3986_v61, %v1994_v1 }
 0x8af   :  { %v2004_v3 = vadd.f32 %v2000_v0, %v1802_v31 }
 0x8b0   :  { %v2003_v4 = vadd.f32 %v1995_v2, %v1801_v28  ;;  %v2051_v28 = vld [vmem:[%s5569_s13 + $0x10] sm:$0xff] }
 0x8b1   :  { %v2010_v6 = vsel %vm215_vm0, %v2004_v3, 0.0  ;;  %v4521_v31 = vpack.c.bf16 %v2052_v29, %v2051_v28 }
 0x8b2   :  { %2011 = vadd.xlane.f32.xlu0 %v2010_v6  ;;  %v2007_v9 = vsel %vm215_vm0, %v2003_v4, 0.0 }
 0x8b3   :  { %2008 = vadd.xlane.f32.xlu1 %v2007_v9  ;;  %4522 = vmatprep.subr.bf16.mxu1 %v4521_v31 }
 0x8b4   :  { %4524 = vmatpush3.bf16.msra.mxu1 %v4521_v31 }
 0x8b5   :  { %4324 = vmatprep.subr.mxu1 %v4707_v8 }
 0x93f   :  { %v2012_v10 = vpop.xlane.xlu0 %2011 }
 0x940   :  { %v2014_v14 = vmul.f32 0.03125, %v2012_v10  ;;  %v2009_v15 = vpop.xlane.xlu1 %2008 }
 0x941   :  { %v2013_v16 = vmul.f32 0.03125, %v2009_v15 }
 0x942   :  { %v2016_v17 = vsub.f32 %v2004_v3, %v2014_v14 }
 0x943   :  { %v2015_v18 = vsub.f32 %v2003_v4, %v2013_v16 }
 0x944   :  { %v2018_v19 = vmul.f32 %v2016_v17, %v2016_v17 }
 0x945   :  { %v2017_v20 = vmul.f32 %v2015_v18, %v2015_v18 }
 0x946   :  { %v2022_v21 = vsel %vm215_vm0, %v2018_v19, 0.0 }
 0x947   :  { %2023 = vadd.xlane.f32.xlu0 %v2022_v21  ;;  %v2019_v22 = vsel %vm215_vm0, %v2017_v20, 0.0 }
 0x948   :  { %2020 = vadd.xlane.f32.xlu1 %v2019_v22 }
 0x9d4   :  { %v2024_v32 = vpop.xlane.xlu0 %2023 }
 0x9d5   :  { %v2026_v33 = vmul.f32 0.03125, %v2024_v32  ;;  %v2021_v34 = vpop.xlane.xlu1 %2020 }
 0x9d6   :  { %v2025_v36 = vmul.f32 0.03125, %v2021_v34 }
 0x9d7   :  { %v2028_v30 = vadd.f32 1e-05, %v2026_v33 }
 0x9d8   :  { %v2027_v37 = vadd.f32 1e-05, %v2025_v36 }
 0x9d9   :  { %4631 = vrsqrt.f32 %v2028_v30 }
 0x9da   :  { %4633 = vrsqrt.f32 %v2027_v37 }
 0x9e3   :  { %v4632_v11 = vpop.eup %4631 }
 0x9e4   :  { %v4634_v39 = vpop.eup %4633  ;;  %v2032_v40 = vmul.f32 %v4632_v11, %v2016_v17 }
 0x9e5   :  { %v2031_v41 = vmul.f32 %v4634_v39, %v2015_v18 }
 0x9e6   :  { %v2040_v44 = vmul.f32 %v3987_v38, %v2032_v40 }
 0x9e7   :  { %v2039_v46 = vmul.f32 %v3987_v38, %v2031_v41 }
 0x9e8   :  { %v5237_v47 = vadd.f32 %v3988_v43, %v2040_v44 }
 0x9e9   :  { %v5235_v13 = vadd.f32 %v3988_v43, %v2039_v46 }
 0x9eb   :  { %4321 = vmatprep.mubr.msk.f32.mxu1 %vm215_vm0, %v5235_v13 }
 0x9ec   :  { %4322 = vmatmul.mubr.msk.f32.vlgmr.msra.gmra.mrb[24].mxu1 %vm215_vm0, %v5237_v47 }
 0x9ed   :  { %4326 = vmatprep.mubr.msk.f32.mxu1 %vm4708_vm1, %v4707_v8 }
 0xabf   :  { %v4323_v49 = vpop.f32.mrb[24].mxu1 }
 0xac0   :  { %v2132_v50 = vpop.f32.mrb[25].mxu1  ;;  %v5262_v53 = vadd.f32 %v4323_v49, %v3989_v48 }
 0xac1   :  { %v5248_v52 = vadd.f32 %v3989_v48, %v2132_v50 }
 0xac3   :  { %2220 = vrot.lane.b32.xlu0 %v5248_v52, %s4709_s8  ;;  %2142 = vrot.lane.b32.xlu1 %v5248_v52, %s4710_s30 }
 0xac7   :  { %2296 = vrot.lane.b32.xlu0 %v5248_v52, %s4713_s28  ;;  %2218 = vrot.lane.b32.xlu1 %v5248_v52, %s5651_s12 }
 0xacb   :  { %2374 = vrot.lane.b32.xlu0 %v5248_v52, %s5652_s9  ;;  %2298 = vrot.lane.b32.xlu1 %v5248_v52, %s5653_s14 }
 0xacf   :  { %2531 = vrot.lane.b32.xlu0 %v5262_v53, %s4709_s8  ;;  %2376 = vrot.lane.b32.xlu1 %v5248_v52, %s5654_s10  ;;  %s5655_s8 = smov 64  }
 0xad3   :  { %2609 = vrot.lane.b32.xlu0 %v5262_v53, %s5653_s14  ;;  %2453 = vrot.lane.b32.xlu1 %v5262_v53, %s4710_s30  ;;  %s5656_s30 = smov 48  }
 0xad7   :  { %2607 = vrot.lane.b32.xlu0 %v5262_v53, %s4713_s28  ;;  %2529 = vrot.lane.b32.xlu1 %v5262_v53, %s5651_s12  ;;  %s5657_s28 = smov 40   ;;  %s5661_s12 = smov 24  }
 0xadb   :  { %2687 = vrot.lane.b32.xlu1 %v5262_v53, %s5654_s10 }
 0xadf   :  { %2685 = vrot.lane.b32.xlu1 %v5262_v53, %s5652_s9 }
 0xb35   :  { %v2221_v42 = vpop.permute.xlu0 %2220  ;;  %v2143_v54 = vpop.permute.xlu1 %2142 }
 0xb36   :  { %4325 = vmatpush3.xpose.msk.msra.mxu1 %vm300_vm2, %v2143_v54 }
 0xb37   :  { %4329 = vmatprep.subr.mxu1 %v4707_v8 }
 0xb39   :  { %v2297_v7 = vpop.permute.xlu0 %2296  ;;  %4327 = vmatmul.mubr.msk.f32.vlgmr.msra.gmra.mrb[26].mxu1 %vm300_vm2, %v5248_v52  ;;  %v2219_v5 = vpop.permute.xlu1 %2218 }
 0xb3a   :  { %4330 = vmatpush3.xpose.msk.msra.mxu1 %vm300_vm2, %v2221_v42  ;;  %4331 = vmatprep.mubr.msk.f32.mxu1 %vm4708_vm1, %v4707_v8 }
 0xb3b   :  { %4334 = vmatprep.subr.mxu1 %v4707_v8 }
 0xb3d   :  { %v2375_v56 = vpop.permute.xlu0 %2374  ;;  %4332 = vmatmul.mubr.msk.f32.vlgmr.msra.gmra.mrb[28].mxu1 %vm300_vm2, %v2219_v5  ;;  %v2299_v55 = vpop.permute.xlu1 %2298 }
 0xb3e   :  { %4335 = vmatpush3.xpose.msk.msra.mxu1 %vm300_vm2, %v2299_v55  ;;  %4336 = vmatprep.mubr.msk.f32.mxu1 %vm4708_vm1, %v4707_v8 }
 0xb3f   :  { %4339 = vmatprep.subr.mxu1 %v4707_v8 }
 0xb41   :  { %v2532_v59 = vpop.permute.xlu0 %2531  ;;  %4337 = vmatmul.mubr.msk.f32.vlgmr.msra.gmra.mrb[30].mxu1 %vm300_vm2, %v2297_v7  ;;  %v2377_v57 = vpop.permute.xlu1 %2376 }
 0xb42   :  { %4340 = vmatpush3.xpose.msk.msra.mxu1 %vm300_vm2, %v2377_v57  ;;  %4341 = vmatprep.mubr.msk.f32.mxu1 %vm4708_vm1, %v4707_v8 }
 0xb43   :  { %4344 = vmatprep.subr.mxu1 %v4707_v8 }
 0xb45   :  { %v2610_v60 = vpop.permute.xlu0 %2609  ;;  %4342 = vmatmul.mubr.msk.f32.vlgmr.msra.gmra.mrb[32].mxu1 %vm300_vm2, %v2375_v56  ;;  %v2454_v61 = vpop.permute.xlu1 %2453 }
 0xb46   :  { %4345 = vmatpush3.xpose.msk.msra.mxu1 %vm300_vm2, %v2454_v61  ;;  %4355 = vmatpush3.xpose.msk.msra.mxu0 %vm300_vm2, %v2610_v60 }
 0xb47   :  { %4346 = vmatprep.mubr.msk.f32.mxu1 %vm4708_vm1, %v4707_v8  ;;  %4349 = vmatprep.subr.mxu1 %v4707_v8 }
 0xb48   :  { %4364 = vmatprep.subr.mxu0 %v4707_v8 }
 0xb49   :  { %v2608_v62 = vpop.permute.xlu0 %2607  ;;  %4347 = vmatmul.mubr.msk.f32.vlgmr.msra.gmra.mrb[34].mxu1 %vm300_vm2, %v5262_v53  ;;  %v2530_v0 = vpop.permute.xlu1 %2529 }
 0xb4a   :  { %4350 = vmatpush3.xpose.msk.msra.mxu1 %vm300_vm2, %v2532_v59  ;;  %4357 = vmatmul.mubr.msk.f32.vlgmr.msra.gmra.mrb[16].mxu0 %vm300_vm2, %v2608_v62 }
 0xb4b   :  { %4351 = vmatprep.mubr.msk.f32.mxu1 %vm4708_vm1, %v4707_v8  ;;  %4359 = vmatprep.subr.mxu1 %v4707_v8 }
 0xb4c   :  { %4366 = vmatprep.mubr.msk.f32.mxu0 %vm4708_vm1, %v4707_v8 }
 0xb4d   :  { %4352 = vmatmul.mubr.msk.f32.vlgmr.msra.gmra.mrb[36].mxu1 %vm300_vm2, %v2530_v0  ;;  %v2688_v1 = vpop.permute.xlu1 %2687 }
 0xb4e   :  { %4360 = vmatpush3.xpose.msk.msra.mxu1 %vm300_vm2, %v2688_v1  ;;  %4361 = vmatprep.mubr.msk.f32.mxu1 %vm4708_vm1, %v4707_v8 }
 0xb4f   :  { %4369 = vmatprep.subr.mxu1 %v4707_v8 }
 0xb51   :  { %v2686_v2 = vpop.permute.xlu1 %2685 }
 0xb52   :  { %4362 = vmatmul.mubr.msk.f32.vlgmr.msra.gmra.mrb[38].mxu1 %vm300_vm2, %v2686_v2 }
 0xb53   :  { %4371 = vmatprep.mubr.msk.f32.mxu1 %vm4708_vm1, %v4707_v8 }
 0xc0c   :  { %v2214_v3 = vpop.f32.mrb[26].mxu1 }
 0xc0d   :  { %v2763_v4 = vmul.f32 0.35355338, %v2214_v3  ;;  %v4328_v6 = vpop.f32.mrb[27].mxu1 }
 0xc0f   :  { %v5324_v9 = vsel %vm4974_vm3, %v2763_v4, -1e+30 }
 0xc10   :  { %v2292_v10 = vpop.f32.mrb[28].mxu1  ;;  %v2779_v14 = vsel %vm300_vm2, %v5324_v9, -inf }
 0xc11   :  { %v2764_v15 = vmul.f32 0.35355338, %v2292_v10  ;;  %2780 = vmax.xlane.f32.xlu0 %v2779_v14  ;;  %v4333_v16 = vpop.f32.mrb[29].mxu1 }
 0xc13   :  { %v2772_v17 = vsel %vm4984_vm4, %v2764_v15, -1e+30 }
 0xc14   :  { %v2370_v18 = vpop.f32.mrb[30].mxu1  ;;  %v2782_v19 = vsel %vm300_vm2, %v2772_v17, -inf }
 0xc15   :  { %v2765_v20 = vmul.f32 0.35355338, %v2370_v18  ;;  %2783 = vmax.xlane.f32.xlu1 %v2782_v19  ;;  %v4338_v21 = vpop.f32.mrb[31].mxu1 }
 0xc17   :  { %v5333_v35 = vsel %vm4988_vm5, %v2765_v20, -1e+30 }
 0xc18   :  { %v2448_v22 = vpop.f32.mrb[32].mxu1  ;;  %v2785_v23 = vsel %vm300_vm2, %v5333_v35, -inf }
 0xc19   :  { %v2766_v24 = vmul.f32 0.35355338, %v2448_v22  ;;  %2786 = vmax.xlane.f32.xlu0 %v2785_v23  ;;  %v4343_v27 = vpop.f32.mrb[33].mxu1 }
 0xc1b   :  { %v2774_v45 = vsel %vm5002_vm6, %v2766_v24, -1e+30 }
 0xc1c   :  { %v2525_v28 = vpop.f32.mrb[34].mxu1  ;;  %v2788_v29 = vsel %vm300_vm2, %v2774_v45, -inf }
 0xc1d   :  { %v2767_v31 = vmul.f32 0.35355338, %v2525_v28  ;;  %v2681_v32 = vpop.f32.mrb[16].mxu0  ;;  %2789 = vmax.xlane.f32.xlu0 %v2788_v29  ;;  %v4348_v33 = vpop.f32.mrb[35].mxu1 }
 0xc1e   :  { %v2769_v51 = vmul.f32 0.35355338, %v2681_v32  ;;  %v4358_v34 = vpop.f32.mrb[17].mxu0 }
 0xc1f   :  { %v5342_v36 = vsel %vm5008_vm7, %v2767_v31, -1e+30 }
 0xc20   :  { %v2603_v30 = vpop.f32.mrb[36].mxu1  ;;  %v2791_v37 = vsel %vm300_vm2, %v5342_v36, -inf  ;;  %v2777_v38 = vsel %vm5029_vm10, %v2769_v51, -1e+30 }
 0xc21   :  { %v2768_v11 = vmul.f32 0.35355338, %v2603_v30  ;;  %2792 = vmax.xlane.f32.xlu1 %v2791_v37  ;;  %v4353_v58 = vpop.f32.mrb[37].mxu1  ;;  %v2797_v40 = vsel %vm300_vm2, %v2777_v38, -inf }
 0xc23   :  { %v2776_v39 = vsel %vm5016_vm8, %v2768_v11, -1e+30 }
 0xc24   :  { %v2794_v41 = vsel %vm300_vm2, %v2776_v39, -inf }
 0xc25   :  { %2798 = vmax.xlane.f32.xlu1 %v2797_v40  ;;  %2795 = vmax.xlane.f32.xlu0 %v2794_v41  ;;  %v2759_v63 = vpop.f32.mrb[38].mxu1 }
 0xc26   :  { %v2770_v43 = vmul.f32 0.35355338, %v2759_v63  ;;  %v4363_v44 = vpop.f32.mrb[39].mxu1 }
 0xc28   :  { %v2778_v46 = vsel %vm5025_vm9, %v2770_v43, -1e+30 }
 0xc29   :  { %v2800_v48 = vsel %vm300_vm2, %v2778_v46, -inf }
 0xc2a   :  { %2801 = vmax.xlane.f32.xlu0 %v2800_v48 }
 0xc36   :  { %2867 = vrot.lane.b32.xlu1 %v5248_v52, %s5655_s8 }
 0xc3a   :  { %3019 = vrot.lane.b32.xlu1 %v5248_v52, %s5656_s30 }
 0xc3e   :  { %3095 = vrot.lane.b32.xlu1 %v5248_v52, %s5657_s28 }
 0xc40   :  { %2943 = vrot.lane.b32.xlu0 %v5248_v52, %s5658_s7 }
 0xc42   :  { %3262 = vrot.lane.b32.xlu1 %v5262_v53, %s5658_s7 }
 0xc44   :  { %3186 = vrot.lane.b32.xlu0 %v5262_v53, %s5655_s8 }
 0xc9e   :  { %v2781_v12 = vpop.xlane.xlu0 %2780 }
 0xc9f   :  { %v2803_v52 = vsub.f32 %v5324_v9, %v2781_v12 }
 0xca1   :  { %v2811_v62 = vmul.f32 1.442695, %v2803_v52 }
 0xca2   :  { %v2784_v25 = vpop.xlane.xlu1 %2783 }
 0xca3   :  { %v2804_v26 = vsub.f32 %v2772_v17, %v2784_v25 }
 0xca5   :  { %v2813_v49 = vmul.f32 1.442695, %v2804_v26 }
 0xca6   :  { %v2787_v50 = vpop.xlane.xlu0 %2786 }
 0xca7   :  { %4635 = vpow2.f32 %v2813_v49  ;;  %v2805_v2 = vsub.f32 %v5333_v35, %v2787_v50 }
 0xca9   :  { %v2815_v10 = vmul.f32 1.442695, %v2805_v2  ;;  %v3507_v2 = vld [vmem:[%s5571_s15 + $0x10] sm:$0xff] }
 0xcaa   :  { %v2790_v42 = vpop.xlane.xlu0 %2789 }
 0xcab   :  { %v2806_v54 = vsub.f32 %v2774_v45, %v2790_v42 }
 0xcad   :  { %v2817_v7 = vmul.f32 1.442695, %v2806_v54 }
 0xcae   :  { %v2793_v5 = vpop.xlane.xlu1 %2792 }
 0xcaf   :  { %4637 = vpow2.f32 %v2817_v7  ;;  %v2807_v14 = vsub.f32 %v5342_v36, %v2793_v5 }
 0xcb1   :  { %v4636_v56 = vpop.eup %4635  ;;  %v2819_v18 = vmul.f32 1.442695, %v2807_v14 }
 0xcb2   :  { %v2796_v55 = vpop.xlane.xlu0 %2795  ;;  %v2799_v59 = vpop.xlane.xlu1 %2798  ;;  %v2830_v57 = vsel %vm300_vm2, %v4636_v56, 0.0 }
 0xcb3   :  { %v2808_v60 = vsub.f32 %v2776_v39, %v2796_v55  ;;  %v2809_v61 = vsub.f32 %v2777_v38, %v2799_v59  ;;  %2831 = vadd.xlane.f32.xlu0 %v2830_v57 }
 0xcb5   :  { %v2821_v0 = vmul.f32 1.442695, %v2808_v60  ;;  %v2823_v1 = vmul.f32 1.442695, %v2809_v61  ;;  %v3505_v61 = vld [vmem:[%s5571_s15] sm:$0xff] }
 0xcb6   :  { %v2868_v3 = vpop.permute.xlu1 %2867 }
 0xcb7   :  { %4639 = vpow2.f32 %v2821_v0  ;;  %v2802_v4 = vpop.xlane.xlu0 %2801  ;;  %4365 = vmatpush3.msra.mxu0 %v2868_v3  ;;  %v3508_v3 = vld [vmem:[%s5571_s15 + $0x18] sm:$0xff] }
 0xcb8   :  { %4641 = vpow2.f32 %v2823_v1  ;;  %v2810_v6 = vsub.f32 %v2778_v46, %v2802_v4  ;;  %4374 = vmatprep.subr.mxu0 %v4707_v8  ;;  %v4529_v4 = vpack.c.bf16 %v3508_v3, %v3507_v2 }
 0xcb9   :  { %v4638_v9 = vpop.eup %4637  ;;  %4643 = vpow2.f32 %v2811_v62  ;;  %v3506_v62 = vld [vmem:[%s5571_s15 + $0x8] sm:$0xff] }
 0xcba   :  { %v2825_v15 = vmul.f32 1.442695, %v2810_v6  ;;  %v2836_v16 = vsel %vm300_vm2, %v4638_v9, 0.0  ;;  %v3020_v51 = vpop.permute.xlu1 %3019  ;;  %v4525_v0 = vpack.c.bf16 %v3506_v62, %v3505_v61 }
 0xcbb   :  { %v2944_v17 = vpop.permute.xlu0 %2943  ;;  %2837 = vadd.xlane.f32.xlu0 %v2836_v16 }
 0xcbc   :  { %4645 = vpow2.f32 %v2825_v15  ;;  %4370 = vmatpush3.msra.mxu1 %v2944_v17 }
 0xcbd   :  { %4379 = vmatprep.subr.mxu1 %v4707_v8  ;;  %4647 = vpow2.f32 %v2815_v10 }
 0xcbe   :  { %4649 = vpow2.f32 %v2819_v18  ;;  %v3096_v34 = vpop.permute.xlu1 %3095 }
 0xcbf   :  { %v3187_v32 = vpop.permute.xlu0 %3186 }
 0xcc1   :  { %v4640_v19 = vpop.eup %4639 }
 0xcc2   :  { %v5374_v20 = vpop.eup %4641  ;;  %v2842_v21 = vsel %vm300_vm2, %v4640_v19, 0.0  ;;  %v3263_v11 = vpop.permute.xlu1 %3262 }
 0xcc3   :  { %v4644_v35 = vpop.eup %4643  ;;  %2843 = vadd.xlane.f32.xlu0 %v2842_v21  ;;  %v2845_v22 = vsel %vm300_vm2, %v5374_v20, 0.0 }
 0xcc4   :  { %2846 = vadd.xlane.f32.xlu1 %v2845_v22  ;;  %v2827_v24 = vsel %vm300_vm2, %v4644_v35, 0.0 }
 0xcc6   :  { %v4646_v23 = vpop.eup %4645 }
 0xcc7   :  { %v2848_v27 = vsel %vm300_vm2, %v4646_v23, 0.0  ;;  %v4648_v45 = vpop.eup %4647 }
 0xcc8   :  { %2828 = vadd.xlane.f32.xlu1 %v2827_v24  ;;  %2849 = vadd.xlane.f32.xlu0 %v2848_v27  ;;  %v2833_v28 = vsel %vm300_vm2, %v4648_v45, 0.0  ;;  %v4650_v29 = vpop.eup %4649 }
 0xcc9   :  { %v2839_v31 = vsel %vm300_vm2, %v4650_v29, 0.0 }
 0xccc   :  { %2834 = vadd.xlane.f32.xlu1 %v2833_v28 }
 0xcd0   :  { %2840 = vadd.xlane.f32.xlu1 %v2839_v31 }
 0xcde   :  { %3338 = vrot.lane.b32.xlu0 %v5262_v53, %s5656_s30 }
 0xce1   :  { %3414 = vrot.lane.b32.xlu1 %v5262_v53, %s5657_s28 }
 0xd40   :  { %v2832_v33 = vpop.xlane.xlu0 %2831 }
 0xd41   :  { %4651 = vrcp.f32 %v2832_v33 }
 0xd48   :  { %v2838_v36 = vpop.xlane.xlu0 %2837 }
 0xd49   :  { %4653 = vrcp.f32 %v2838_v36 }
 0xd4b   :  { %v4652_v30 = vpop.eup %4651 }
 0xd4c   :  { %v2854_v37 = vmul.f32 %v4652_v30, %v4636_v56 }
 0xd4e   :  { %4372 = vmatmul.mubr.msk.f32.vlgmr.msra.gmra.mrb[40].mxu1 %vm300_vm2, %v2854_v37 }
 0xd4f   :  { %4380 = vmatpush3.msra.mxu1 %v3096_v34  ;;  %4381 = vmatprep.mubr.msk.f32.mxu1 %vm4708_vm1, %v4707_v8 }
 0xd50   :  { %v2844_v58 = vpop.xlane.xlu0 %2843  ;;  %4389 = vmatprep.subr.mxu1 %v4707_v8 }
 0xd51   :  { %4655 = vrcp.f32 %v2844_v58  ;;  %v2847_v53 = vpop.xlane.xlu1 %2846 }
 0xd53   :  { %v4654_v38 = vpop.eup %4653 }
 0xd54   :  { %v2858_v39 = vmul.f32 %v4654_v38, %v4638_v9 }
 0xd55   :  { %v2829_v40 = vpop.xlane.xlu1 %2828  ;;  %v2850_v41 = vpop.xlane.xlu0 %2849 }
 0xd56   :  { %4657 = vrcp.f32 %v2829_v40  ;;  %4382 = vmatmul.mubr.msk.f32.vlgmr.msra.gmra.mrb[42].mxu1 %vm300_vm2, %v2858_v39 }
 0xd57   :  { %4659 = vrcp.f32 %v2850_v41  ;;  %4390 = vmatpush3.msra.mxu1 %v3263_v11  ;;  %4391 = vmatprep.mubr.msk.f32.mxu1 %vm4708_vm1, %v4707_v8 }
 0xd58   :  { %4399 = vmatprep.subr.mxu1 %v4707_v8 }
 0xd59   :  { %v2835_v63 = vpop.xlane.xlu1 %2834  ;;  %v3339_v56 = vpop.permute.xlu0 %3338 }
 0xd5a   :  { %4661 = vrcp.f32 %v2835_v63 }
 0xd5b   :  { %v4656_v43 = vpop.eup %4655 }
 0xd5c   :  { %v2862_v44 = vmul.f32 %v4656_v43, %v4640_v19 }
 0xd5d   :  { %v2841_v46 = vpop.xlane.xlu1 %2840 }
 0xd5e   :  { %4663 = vrcp.f32 %v2841_v46  ;;  %4392 = vmatmul.mubr.msk.f32.vlgmr.msra.gmra.mrb[44].mxu1 %vm300_vm2, %v2862_v44 }
 0xd5f   :  { %4401 = vmatprep.mubr.msk.f32.mxu1 %vm4708_vm1, %v4707_v8  ;;  %4665 = vrcp.f32 %v2847_v53 }
 0xd60   :  { %v4658_v48 = vpop.eup %4657 }
 0xd61   :  { %v4660_v12 = vpop.eup %4659  ;;  %v2852_v25 = vmul.f32 %v4658_v48, %v4644_v35  ;;  %v3415_v26 = vpop.permute.xlu1 %3414 }
 0xd62   :  { %v2866_v49 = vmul.f32 %v4660_v12, %v4646_v23  ;;  %4400 = vmatpush3.msra.mxu1 %v3415_v26 }
 0xd63   :  { %4367 = vmatmul.mubr.msk.f32.vlgmr.msra.gmra.mrb[18].mxu0 %vm300_vm2, %v2852_v25  ;;  %v3644_v25 = vld [vmem:[%s5575_s19 + $0x8] sm:$0xff] }
 0xd64   :  { %v4662_v50 = vpop.eup %4661  ;;  %4375 = vmatpush3.msra.mxu0 %v3020_v51  ;;  %4402 = vmatmul.mubr.msk.f32.vlgmr.msra.gmra.mrb[46].mxu1 %vm300_vm2, %v2866_v49  ;;  %v4016_v51 = vld [vmem:[%s5572_s16] ss:$0 sm:$0xff]  ;;  %v3645_v49 = vld [vmem:[%s5575_s19 + $0x10] sm:$0xff] }
 0xd65   :  { %v2856_v42 = vmul.f32 %v4662_v50, %v4648_v45  ;;  %4376 = vmatprep.mubr.msk.f32.mxu0 %vm4708_vm1, %v4707_v8  ;;  %4384 = vmatprep.subr.mxu0 %v4707_v8  ;;  %v3646_v50 = vld [vmem:[%s5575_s19 + $0x18] sm:$0xff] }
 0xd67   :  { %4377 = vmatmul.mubr.msk.f32.vlgmr.msra.gmra.mrb[20].mxu0 %vm300_vm2, %v2856_v42  ;;  %v4537_v42 = vpack.c.bf16 %v3646_v50, %v3645_v49 }
 0xd68   :  { %v4664_v54 = vpop.eup %4663  ;;  %4385 = vmatpush3.msra.mxu0 %v3187_v32  ;;  %4386 = vmatprep.mubr.msk.f32.mxu0 %vm4708_vm1, %v4707_v8 }
 0xd69   :  { %v2860_v7 = vmul.f32 %v4664_v54, %v4650_v29  ;;  %4394 = vmatprep.subr.mxu0 %v4707_v8  ;;  %v4666_v5 = vpop.eup %4665  ;;  %v3745_v54 = vld [vmem:[%s5577_s21] sm:$0xff] }
 0xd6a   :  { %v2864_v52 = vmul.f32 %v4666_v5, %v5374_v20  ;;  %v3747_v5 = vld [vmem:[%s5577_s21 + $0x10] sm:$0xff] }
 0xd6b   :  { %4387 = vmatmul.mubr.msk.f32.vlgmr.msra.gmra.mrb[22].mxu0 %vm300_vm2, %v2860_v7  ;;  %v3746_v7 = vld [vmem:[%s5577_s21 + $0x8] sm:$0xff] }
 0xd6c   :  { %4395 = vmatpush3.msra.mxu0 %v3339_v56  ;;  %4396 = vmatprep.mubr.msk.f32.mxu0 %vm4708_vm1, %v4707_v8  ;;  %v4541_v56 = vpack.c.bf16 %v3746_v7, %v3745_v54 }
 0xd6d   :  { %4526 = vmatprep.subr.bf16.mxu0 %v4525_v0 }
 0xd6f   :  { %4397 = vmatmul.mubr.msk.f32.vlgmr.msra.gmra.mrb[24].mxu0 %vm300_vm2, %v2864_v52  ;;  %v3748_v52 = vld [vmem:[%s5577_s21 + $0x18] sm:$0xff] }
 0xd70   :  { %4528 = vmatpush3.bf16.msra.mxu0 %v4525_v0 }
 0xd71   :  { %4530 = vmatprep.subr.bf16.mxu0 %v4529_v4 }
 0xd74   :  { %4532 = vmatpush3.bf16.msra.mxu0 %v4529_v4  ;;  %v4019_v4 = vld [vmem:[%s5573_s17] ss:$0 sm:$0xff] }
 0xd75   :  { %4542 = vmatprep.subr.bf16.mxu0 %v4541_v56 }
 0xe21   :  { %v3015_v55 = vpop.f32.mrb[40].mxu1 }
 0xe22   :  { %3172 = vrot.lane.b32.xlu0 %v3015_v55, %s5659_s0  ;;  %v4373_v59 = vpop.f32.mrb[41].mxu1  ;;  %v4545_v55 = vpack.c.bf16 %v3748_v52, %v3747_v5 }
 0xe23   :  { %v3749_v59 = vld [vmem:[%s5577_s21 + $0x20] sm:$0xff] }
 0xe29   :  { %v3167_v57 = vpop.f32.mrb[42].mxu1 }
 0xe2a   :  { %v4383_v60 = vpop.f32.mrb[43].mxu1 }
 0xe31   :  { %v3334_v8 = vpop.f32.mrb[44].mxu1 }
 0xe32   :  { %3491 = vrot.lane.b32.xlu0 %v3334_v8, %s5659_s0  ;;  %v4393_v1 = vpop.f32.mrb[45].mxu1 }
 0xe36   :  { %v2939_v6 = vpop.f32.mrb[18].mxu0 }
 0xe37   :  { %v4368_v9 = vpop.f32.mrb[19].mxu0  ;;  %v3486_v10 = vpop.f32.mrb[46].mxu1 }
 0xe38   :  { %v4403_v14 = vpop.f32.mrb[47].mxu1  ;;  %v4020_v9 = vld [vmem:[%s5574_s18] ss:$0 sm:$0xff] }
 0xe3a   :  { %v3091_v15 = vpop.f32.mrb[20].mxu0 }
 0xe3b   :  { %3176 = vrot.lane.b32.xlu1 %v3091_v15, %s5660_s3  ;;  %v4378_v16 = vpop.f32.mrb[21].mxu0 }
 0xe3e   :  { %v3258_v17 = vpop.f32.mrb[22].mxu0 }
 0xe3f   :  { %3180 = vrot.lane.b32.xlu1 %v3167_v57, %s5661_s12  ;;  %v4388_v18 = vpop.f32.mrb[23].mxu0  ;;  %v3750_v57 = vld [vmem:[%s5577_s21 + $0x28] sm:$0xff] }
 0xe40   :  { %v4549_v60 = vpack.c.bf16 %v3750_v57, %v3749_v59 }
 0xe42   :  { %v3410_v19 = vpop.f32.mrb[24].mxu0 }
 0xe43   :  { %3495 = vrot.lane.b32.xlu0 %v3410_v19, %s5660_s3  ;;  %v4398_v20 = vpop.f32.mrb[25].mxu0  ;;  %3499 = vrot.lane.b32.xlu1 %v3486_v10, %s5661_s12  ;;  %v3751_v19 = vld [vmem:[%s5577_s21 + $0x30] sm:$0xff] }
 0xe44   :  { %v3752_v20 = vld [vmem:[%s5577_s21 + $0x38] sm:$0xff] }
 0xe94   :  { %v3173_v21 = vpop.permute.xlu0 %3172 }
 0xe95   :  { %v3183_v22 = vsel %vm300_vm2, %v2939_v6, %v3173_v21  ;;  %v4553_v21 = vpack.c.bf16 %v3752_v20, %v3751_v19 }
 0xea4   :  { %v3492_v23 = vpop.permute.xlu0 %3491 }
 0xea5   :  { %v3502_v28 = vsel %vm300_vm2, %v3258_v17, %v3492_v23 }
 0xead   :  { %v3177_v35 = vpop.permute.xlu1 %3176 }
 0xeae   :  { %v3184_v24 = vsel %vm1341_vm11, %v3183_v22, %v3177_v35  ;;  %v3753_v35 = vld [vmem:[%s5577_s21 + $0x40] sm:$0xff]  ;;  %v3754_v22 = vld [vmem:[%s5577_s21 + $0x48] sm:$0xff] }
 0xeaf   :  { %v4557_v23 = vpack.c.bf16 %v3754_v22, %v3753_v35 }
 0xeb1   :  { %v3181_v27 = vpop.permute.xlu1 %3180 }
 0xeb2   :  { %v3185_v45 = vsel %vm1343_vm12, %v3184_v24, %v3181_v27  ;;  %v3755_v24 = vld [vmem:[%s5577_s21 + $0x50] sm:$0xff]  ;;  %v3756_v27 = vld [vmem:[%s5577_s21 + $0x58] sm:$0xff] }
 0xeb3   :  { %4412 = vmatprep.mubr.msk.f32.mxu0 %vm215_vm0, %v3185_v45  ;;  %v4561_v45 = vpack.c.bf16 %v3756_v27, %v3755_v24 }
 0xeb5   :  { %v3496_v29 = vpop.permute.xlu0 %3495  ;;  %v3500_v31 = vpop.permute.xlu1 %3499 }
 0xeb6   :  { %v3503_v32 = vsel %vm1341_vm11, %v3502_v28, %v3496_v29  ;;  %v3757_v28 = vld [vmem:[%s5577_s21 + $0x60] sm:$0xff]  ;;  %v3758_v29 = vld [vmem:[%s5577_s21 + $0x68] sm:$0xff] }
 0xeb7   :  { %v3504_v33 = vsel %vm1343_vm12, %v3503_v32, %v3500_v31  ;;  %v4565_v31 = vpack.c.bf16 %v3758_v29, %v3757_v28  ;;  %v3759_v32 = vld [vmem:[%s5577_s21 + $0x70] sm:$0xff] }
 0xeb8   :  { %4413 = vmatmul.mubr.msk.f32.vlgmr.msra.gmra.mrb[26].mxu0 %vm215_vm0, %v3504_v33  ;;  %v3760_v33 = vld [vmem:[%s5577_s21 + $0x78] sm:$0xff] }
 0xeb9   :  { %4544 = vmatpush3.bf16.msra.mxu0 %v4541_v56 }
 0xeba   :  { %4546 = vmatprep.subr.bf16.mxu0 %v4545_v55 }
 0xebd   :  { %4548 = vmatpush3.bf16.msra.mxu0 %v4545_v55 }
 0xebe   :  { %4550 = vmatprep.subr.bf16.mxu0 %v4549_v60 }
 0xec1   :  { %4552 = vmatpush3.bf16.msra.mxu0 %v4549_v60 }
 0xec2   :  { %4554 = vmatprep.subr.bf16.mxu0 %v4553_v21 }
 0xec5   :  { %4556 = vmatpush3.bf16.msra.mxu0 %v4553_v21 }
 0xec6   :  { %4558 = vmatprep.subr.bf16.mxu0 %v4557_v23 }
 0xec9   :  { %4560 = vmatpush3.bf16.msra.mxu0 %v4557_v23 }
 0xeca   :  { %4562 = vmatprep.subr.bf16.mxu0 %v4561_v45 }
 0xecd   :  { %4564 = vmatpush3.bf16.msra.mxu0 %v4561_v45 }
 0xece   :  { %4566 = vmatprep.subr.bf16.mxu0 %v4565_v31 }
 0xed1   :  { %4568 = vmatpush3.bf16.msra.mxu0 %v4565_v31 }
 0xf8b   :  { %v4414_v34 = vpop.f32.mrb[26].mxu0 }
 0xf8c   :  { %v3594_v36 = vadd.f32 %v4414_v34, %v4016_v51  ;;  %v3588_v30 = vpop.f32.mrb[27].mxu0  ;;  %v4021_v34 = vld [vmem:[%s5576_s20] ss:$0 sm:$0xff] }
 0xf8d   :  { %v3589_v37 = vadd.f32 %v4016_v51, %v3588_v30  ;;  %v4569_v51 = vpack.c.bf16 %v3760_v33, %v3759_v32 }
 0xf8e   :  { %v3598_v11 = vadd.f32 %v3594_v36, %v5237_v47 }
 0xf8f   :  { %v3597_v58 = vadd.f32 %v3589_v37, %v5235_v13  ;;  %v3643_v13 = vld [vmem:[%s5575_s19] sm:$0xff]  ;;  %4570 = vmatprep.subr.bf16.mxu0 %v4569_v51 }
 0xf90   :  { %v3604_v53 = vsel %vm215_vm0, %v3598_v11, 0.0  ;;  %v4533_v26 = vpack.c.bf16 %v3644_v25, %v3643_v13  ;;  %4572 = vmatpush3.bf16.msra.mxu0 %v4569_v51 }
 0xf91   :  { %3605 = vadd.xlane.f32.xlu1 %v3604_v53  ;;  %v3601_v38 = vsel %vm215_vm0, %v3597_v58, 0.0 }
 0xf92   :  { %3602 = vadd.xlane.f32.xlu0 %v3601_v38  ;;  %4534 = vmatprep.subr.bf16.mxu1 %v4533_v26 }
 0xf93   :  { %4536 = vmatpush3.bf16.msra.mxu1 %v4533_v26 }
 0xf94   :  { %4538 = vmatprep.subr.bf16.mxu1 %v4537_v42 }
 0xf97   :  { %4540 = vmatpush3.bf16.msra.mxu1 %v4537_v42 }
0x101e   :  { %v3606_v39 = vpop.xlane.xlu1 %3605 }
0x101f   :  { %v3608_v40 = vmul.f32 0.03125, %v3606_v39  ;;  %v3603_v41 = vpop.xlane.xlu0 %3602 }
0x1020   :  { %v3607_v63 = vmul.f32 0.03125, %v3603_v41 }
0x1021   :  { %v3610_v43 = vsub.f32 %v3598_v11, %v3608_v40 }
0x1022   :  { %v3609_v44 = vsub.f32 %v3597_v58, %v3607_v63 }
0x1023   :  { %v3612_v12 = vmul.f32 %v3610_v43, %v3610_v43 }
0x1024   :  { %v3611_v46 = vmul.f32 %v3609_v44, %v3609_v44 }
0x1025   :  { %v3616_v47 = vsel %vm215_vm0, %v3612_v12, 0.0 }
0x1026   :  { %v3613_v48 = vsel %vm215_vm0, %v3611_v46, 0.0 }
0x1027   :  { %3614 = vadd.xlane.f32.xlu0 %v3613_v48  ;;  %v4024_v48 = vld [vmem:[%s5578_s22] ss:$0 sm:$0xff] }
0x102b   :  { %3617 = vadd.xlane.f32.xlu0 %v3616_v47 }
0x10b4   :  { %v3615_v61 = vpop.xlane.xlu0 %3614 }
0x10b5   :  { %v3619_v62 = vmul.f32 0.03125, %v3615_v61 }
0x10b7   :  { %v3621_v0 = vadd.f32 1e-05, %v3619_v62 }
0x10b8   :  { %v3618_v8 = vpop.xlane.xlu0 %3617 }
0x10b9   :  { %4667 = vrsqrt.f32 %v3621_v0  ;;  %v3620_v1 = vmul.f32 0.03125, %v3618_v8 }
0x10bb   :  { %v3622_v2 = vadd.f32 1e-05, %v3620_v1 }
0x10bd   :  { %4669 = vrsqrt.f32 %v3622_v2 }
0x10c3   :  { %v4668_v3 = vpop.eup %4667 }
0x10c4   :  { %v3625_v6 = vmul.f32 %v4668_v3, %v3609_v44 }
0x10c6   :  { %v3633_v10 = vmul.f32 %v4019_v4, %v3625_v6  ;;  %v4025_v6 = vld [vmem:[%s5579_s23] ss:$0 sm:$0xff] }
0x10c7   :  { %v4670_v14 = vpop.eup %4669 }
0x10c8   :  { %v3626_v15 = vmul.f32 %v4670_v14, %v3610_v43  ;;  %v3641_v16 = vadd.f32 %v4020_v9, %v3633_v10  ;;  %v4026_v14 = vld [vmem:[%s5580_s24] ss:$0 sm:$0xff] }
0x10ca   :  { %v3634_v17 = vmul.f32 %v4019_v4, %v3626_v15  ;;  %4423 = vmatprep.mubr.msk.f32.mxu1 %vm215_vm0, %v3641_v16 }
0x10cc   :  { %v3642_v18 = vadd.f32 %v4020_v9, %v3634_v17 }
0x10ce   :  { %4424 = vmatmul.mubr.msk.f32.vlgmr.msra.gmra.mrb[48].mxu1 %vm215_vm0, %v3642_v18 }
0x11a1   :  { %v4425_v36 = vpop.f32.mrb[48].mxu1 }
0x11a2   :  { %v3732_v30 = vadd.f32 %v4425_v36, %v4021_v34  ;;  %v3726_v37 = vpop.f32.mrb[49].mxu1 }
0x11a3   :  { %v3727_v11 = vadd.f32 %v4021_v34, %v3726_v37 }
0x11a4   :  { %v3738_v58 = vmul.f32 0.70710677, %v3732_v30  ;;  %v3736_v43 = vmul.f32 0.5, %v3732_v30 }
0x11a5   :  { %v3737_v53 = vmul.f32 0.70710677, %v3727_v11  ;;  %v3735_v41 = vmul.f32 0.5, %v3727_v11 }
0x11a6   :  { %4671 = verf.f32 %v3738_v58  ;;  %v4027_v58 = vld [vmem:[%s5581_s25] ss:$0 sm:$0xff] }
0x11a7   :  { %4673 = verf.f32 %v3737_v53 }
0x11b0   :  { %v4672_v38 = vpop.eup %4671 }
0x11b1   :  { %v4674_v39 = vpop.eup %4673  ;;  %v3742_v40 = vadd.f32 1.0, %v4672_v38 }
0x11b2   :  { %v3741_v63 = vadd.f32 1.0, %v4674_v39 }
0x11b3   :  { %v3744_v46 = vmul.f32 %v3742_v40, %v3736_v43  ;;  %v4028_v40 = vld [vmem:[%s5582_s26] ss:$0 sm:$0xff] }
0x11b4   :  { %v3743_v44 = vmul.f32 %v3741_v63, %v3735_v41 }
0x11b6   :  { %4458 = vmatprep.mubr.f32.mxu0 %v3743_v44 }
0x11b7   :  { %4459 = vmatmul.mubr.f32.vlgmr.msra.gmra.mrb[28].mxu0 %v3744_v46 }
0x128a   :  { %v4460_v12 = vpop.f32.mrb[28].mxu0 }
0x128b   :  { %v3840_v47 = vadd.f32 %v4460_v12, %v4024_v48  ;;  %v3834_v13 = vpop.f32.mrb[29].mxu0 }
0x128c   :  { %v3835_v25 = vadd.f32 %v4024_v48, %v3834_v13 }
0x128d   :  { %v3844_v26 = vadd.f32 %v3840_v47, %v3642_v18 }
0x128e   :  { %v3843_v49 = vadd.f32 %v3835_v25, %v3641_v16 }
0x128f   :  { %v3850_v50 = vsel %vm215_vm0, %v3844_v26, 0.0 }
0x1290   :  { %3851 = vadd.xlane.f32.xlu0 %v3850_v50  ;;  %v3847_v42 = vsel %vm215_vm0, %v3843_v49, 0.0 }
0x1291   :  { %3848 = vadd.xlane.f32.xlu1 %v3847_v42 }
0x131d   :  { %v3852_v54 = vpop.xlane.xlu0 %3851 }
0x131e   :  { %v3854_v7 = vmul.f32 0.03125, %v3852_v54  ;;  %v3849_v5 = vpop.xlane.xlu1 %3848 }
0x131f   :  { %v3853_v56 = vmul.f32 0.03125, %v3849_v5 }
0x1320   :  { %v3856_v52 = vsub.f32 %v3844_v26, %v3854_v7 }
0x1321   :  { %v3855_v55 = vsub.f32 %v3843_v49, %v3853_v56 }
0x1322   :  { %v3858_v59 = vmul.f32 %v3856_v52, %v3856_v52 }
0x1323   :  { %v3857_v57 = vmul.f32 %v3855_v55, %v3855_v55 }
0x1324   :  { %v3862_v60 = vsel %vm215_vm0, %v3858_v59, 0.0 }
0x1325   :  { %3863 = vadd.xlane.f32.xlu0 %v3862_v60  ;;  %v3859_v61 = vsel %vm215_vm0, %v3857_v57, 0.0 }
0x1326   :  { %3860 = vadd.xlane.f32.xlu1 %v3859_v61 }
0x13b2   :  { %v3864_v62 = vpop.xlane.xlu0 %3863 }
0x13b3   :  { %v3866_v0 = vmul.f32 0.03125, %v3864_v62  ;;  %v3861_v8 = vpop.xlane.xlu1 %3860 }
0x13b4   :  { %v3865_v1 = vmul.f32 0.03125, %v3861_v8 }
0x13b5   :  { %v3868_v2 = vadd.f32 1e-05, %v3866_v0 }
0x13b6   :  { %v3867_v3 = vadd.f32 1e-05, %v3865_v1 }
0x13b7   :  { %4675 = vrsqrt.f32 %v3868_v2 }
0x13b8   :  { %4677 = vrsqrt.f32 %v3867_v3 }
0x13c1   :  { %v4676_v4 = vpop.eup %4675 }
0x13c2   :  { %v4678_v9 = vpop.eup %4677  ;;  %v3872_v10 = vmul.f32 %v4676_v4, %v3856_v52 }
0x13c3   :  { %v3871_v15 = vmul.f32 %v4678_v9, %v3855_v55 }
0x13c4   :  { %v3880_v16 = vmul.f32 %v4025_v6, %v3872_v10 }
0x13c5   :  { %v3879_v17 = vmul.f32 %v4025_v6, %v3871_v15 }
0x13c6   :  { %v3888_v18 = vadd.f32 %v4026_v14, %v3880_v16 }
0x13c7   :  { %v3887_v19 = vadd.f32 %v4026_v14, %v3879_v17 }
0x13c8   :  { %v3894_v20 = vsel %vm215_vm0, %v3888_v18, 0.0 }
0x13c9   :  { %3895 = vadd.xlane.f32.xlu0 %v3894_v20  ;;  %v3891_v21 = vsel %vm215_vm0, %v3887_v19, 0.0 }
0x13ca   :  { %3892 = vadd.xlane.f32.xlu1 %v3891_v21 }
0x1456   :  { %v3896_v35 = vpop.xlane.xlu0 %3895 }
0x1457   :  { %v3898_v22 = vmul.f32 0.03125, %v3896_v35  ;;  %v3893_v23 = vpop.xlane.xlu1 %3892 }
0x1458   :  { %v3897_v24 = vmul.f32 0.03125, %v3893_v23 }
0x1459   :  { %v3900_v27 = vsub.f32 %v3888_v18, %v3898_v22 }
0x145a   :  { %v3899_v45 = vsub.f32 %v3887_v19, %v3897_v24 }
0x145b   :  { %v3902_v28 = vmul.f32 %v3900_v27, %v3900_v27 }
0x145c   :  { %v3901_v29 = vmul.f32 %v3899_v45, %v3899_v45 }
0x145d   :  { %v3906_v31 = vsel %vm215_vm0, %v3902_v28, 0.0 }
0x145e   :  { %3907 = vadd.xlane.f32.xlu0 %v3906_v31  ;;  %v3903_v32 = vsel %vm215_vm0, %v3901_v29, 0.0 }
0x145f   :  { %3904 = vadd.xlane.f32.xlu1 %v3903_v32 }
0x14eb   :  { %v3908_v33 = vpop.xlane.xlu0 %3907 }
0x14ec   :  { %v3910_v51 = vmul.f32 0.03125, %v3908_v33  ;;  %v3905_v34 = vpop.xlane.xlu1 %3904 }
0x14ed   :  { %v3909_v36 = vmul.f32 0.03125, %v3905_v34 }
0x14ee   :  { %v3912_v30 = vadd.f32 1e-05, %v3910_v51 }
0x14ef   :  { %v3911_v37 = vadd.f32 1e-05, %v3909_v36 }
0x14f0   :  { %4679 = vrsqrt.f32 %v3912_v30 }
0x14f1   :  { %4681 = vrsqrt.f32 %v3911_v37 }
0x14fa   :  { %v4680_v11 = vpop.eup %4679 }
0x14fb   :  { %v4682_v53 = vpop.eup %4681  ;;  %v3916_v38 = vmul.f32 %v4680_v11, %v3900_v27 }
0x14fc   :  { %v3915_v39 = vmul.f32 %v4682_v53, %v3899_v45 }
0x14fd   :  { %v3924_v41 = vmul.f32 %v4027_v58, %v3916_v38 }
0x14fe   :  { %v3923_v63 = vmul.f32 %v4027_v58, %v3915_v39 }
0x14ff   :  { %v3932_v43 = vadd.f32 %v4028_v40, %v3924_v41 }
0x1500   :  { %v3931_v44 = vadd.f32 %v4028_v40, %v3923_v63 }
0x1501   :  { %3934 = vst.msk [vmem:[#allocation2 + $0x8] sm:$0xff] %vm215_vm0, %v3932_v43 }
0x1502   :  { %3933 = vst.msk [vmem:[#allocation2] sm:$0xff] %vm215_vm0, %v3931_v44 }
0x1503   :  { %4694 = shalt.err (!%p4691_p4)
}
0x1504   :  { %s4695_s5 = scalar_lea.hbm %s5583_s27, 256 }
0x1505   :  { %p4696_p5 = scmp.ne.s32.totalorder %s5583_s27, %s4695_s5  ;;  %p4699_p6 = scmp.lt.u32.totalorder %s4695_s5, %s5583_s27 }
0x1507   :  { %p4701_p7 = pnand %p4699_p6, %p4696_p5 }
0x1509   :  { %4704 = shalt.err (!%p4701_p7)
}
0x150a   :  { %s4724_s3 = smov 128  }
0x150b   :  { %3946 = dma.vmem_to_hbm [thread:$0]  %s3941_s1, 256, %s5583_s27, [#allocation3], %s4724_s3, %s4724_s3, %s5659_s0  }
0x150c   :  { %4705 = dma.done.wait [#allocation3], 256  }
0x150d   :  { %4706 = vsyncadd [#allocation3], 4294967040 }
0x150e   :  { %3950 = vsyncpa [#allocation3], 1 }

</bundles_post_ra>
